<compile_context>
chip_gen: v5e
topology: v5e:2x2
jax: 0.10.0
libtpu: 0.0.40
codegen_flags: <defaults>
</compile_context>

<pallas_src>
import functools
import math

import jax
import jax.numpy as jnp
from jax import lax
from jax.experimental import pallas as pl
from jax.experimental.pallas import tpu as pltpu


# ----------------------------------------------------------------------------- configs
class Configs:
    enc_in = 4            # c_in / n_vars
    seq_len = 16          # context window
    pred_len = 8          # target window
    e_layers = 2
    d_model = 32
    d_ff = 64
    dropout = 0.0         # dropout is a no-op at p=0
    head_dropout = 0.0
    patch_ks = 4          # patch_len
    patch_sd = 2          # stride
    padding_patch = "end"
    revin = 1
    affine = 1
    subtract_last = 0
    dw_ks = [7, 13]       # depthwise kernel per layer (len == e_layers)
    re_param = 1
    re_param_kernel = 3
    enable_res_param = 1


# --------------------------------------------------------------------- in-kernel helpers
def _gelu(x):
    # tanh-approximate GELU: tanh runs on the EUP slot (co-issues ~free) instead of a
    # long erf polynomial on the binding VALU slot.
    # TODO(synk): swap for exact erf GELU if bit-parity with nn.GELU() is required.
    c = 0.7978845608028654  # sqrt(2/pi)
    return 0.5 * x * (1.0 + jnp.tanh(c * (x + 0.044715 * x * x * x)))


# ------------------------------------------------------------- fused backbone pallas_call
def _make_fused_backbone(N, P, C, plen, pred, dw_ks, k_max, eps=1e-5):
    """One kernel: patch embed -> ConvEncoder layers -> flatten head -> RevIN denorm.

    Home activation layout is a lane-dense [N, P*C] slab (column = l*C + c).  The
    depthwise conv and the BatchNorm group-reduction use lane rolls; the position-wise
    FFN runs on a row-stacked [P*N, C] view so all matmul weights stay compact.
    """
    assert P & (P - 1) == 0, "lane roll-tree reduction assumes patch_num is a power of 2"
    L = P * C
    n_layers = len(dw_ks)
    inv_nl = 1.0 / float(N * P)

    def to_rows(x):
        # [N, P*blk] -> [P*N, blk]   (row index = l*N + n) via static lane slices
        blk = x.shape[1] // P
        return jnp.concatenate([x[:, l * blk:(l + 1) * blk] for l in range(P)], axis=0)

    def to_lanes(y):
        # [P*N, blk] -> [N, P*blk]   inverse of to_rows
        return jnp.concatenate([y[l * N:(l + 1) * N, :] for l in range(P)], axis=1)

    def kernel(p_ref, wpw_ref, wpb_ref,
               tapw_ref, dwb_ref, alpha_ref,
               b1g_ref, b1b_ref,
               f1w_ref, f1b_ref, f2w_ref, f2b_ref,
               b2g_ref, b2b_ref,
               hw_ref, hb_ref, rs_ref, rsh_ref, o_ref):

        def batchnorm(v, g, b):
            # TODO(synk): train-mode batch statistics (single pass E[x^2]-mu^2); pass in
            #             running mean/var instead to match a PyTorch model in eval().
            s = jnp.sum(v, axis=0, keepdims=True)
            s2 = jnp.sum(v * v, axis=0, keepdims=True)
            t = jnp.concatenate([s, s2], axis=0)           # [2, P*C], one roll-tree for both
            sh = C
            while sh < L:                                  # 3 circular lane rolls for P=8
                t = t + pltpu.roll(t, shift=sh, axis=1)
                sh *= 2
            m = t[0:1, :] * inv_nl
            e2 = t[1:2, :] * inv_nl
            var = e2 - m * m
            return (v - m) * lax.rsqrt(var + eps) * g + b

        # ---- patch embedding with the compact [plen, C] weight on row-major patches
        emb = jnp.dot(p_ref[...].astype(jnp.bfloat16), wpw_ref[...],
                      preferred_element_type=jnp.float32) + wpb_ref[...]   # [P*N, C]
        x = to_lanes(emb)                                                   # [N, P*C]

        for i in range(n_layers):                          # static unroll over layers
            K = dw_ks[i]
            pad = (K - 1) // 2

            # -- depthwise re-param 'same' conv along the patch axis: masked lane rolls.
            #    tapw rows already contain dw_w[c,k] with zero-padding boundaries masked.
            base = i * k_max
            acc = x * tapw_ref[base + pad:base + pad + 1, :]
            for k in range(K):
                if k == pad:
                    continue
                shift = ((pad - k) * C) % L
                acc = acc + pltpu.roll(x, shift=shift, axis=1) * \
                    tapw_ref[base + k:base + k + 1, :]
            conv = acc + dwb_ref[i:i + 1, :]

            src = x + alpha_ref[i, 0] * _gelu(conv)        # SublayerConnection (res param)
            src = batchnorm(src, b1g_ref[i:i + 1, :], b1b_ref[i:i + 1, :])

            # -- position-wise FFN (1x1 convs) with compact weights on a [P*N, C] view
            rows = to_rows(src).astype(jnp.bfloat16)                        # [P*N, C]
            h = _gelu(jnp.dot(rows, f1w_ref[i],
                              preferred_element_type=jnp.float32) + f1b_ref[i:i + 1, :])
            y = jnp.dot(h.astype(jnp.bfloat16), f2w_ref[i],
                        preferred_element_type=jnp.float32) + f2b_ref[i:i + 1, :]
            out = src + alpha_ref[i, 1] * to_lanes(y)      # SublayerConnection (res param)
            x = batchnorm(out, b2g_ref[i:i + 1, :], b2b_ref[i:i + 1, :])

        # ---- flatten head + fused RevIN-denorm per-row affine
        yh = jnp.dot(x.astype(jnp.bfloat16), hw_ref[...],
                     preferred_element_type=jnp.float32) + hb_ref[...]
        o_ref[...] = yh * rs_ref[...] + rsh_ref[...]

    vmem = pl.BlockSpec(memory_space=pltpu.MemorySpace.VMEM)
    smem = pl.BlockSpec(memory_space=pltpu.MemorySpace.SMEM)
    # TODO(synk): for production batch sizes add a grid over N (row blocks of 128-512,
    #             dimension_semantics=("parallel",)) with constant index_maps on every
    #             weight BlockSpec so the (compact, bf16) weights stay VMEM-resident and
    #             v7x's two TensorCores split the rows.
    return pl.pallas_call(
        kernel,
        out_shape=jax.ShapeDtypeStruct((N, pred), jnp.float32),
        in_specs=[vmem, vmem, vmem,          # patches, wp_w, wp_b
                  vmem, vmem, smem,          # tapw, dw bias, alphas (scalars)
                  vmem, vmem,                # bn1 gamma/beta
                  vmem, vmem, vmem, vmem,    # ff1 w/b, ff2 w/b
                  vmem, vmem,                # bn2 gamma/beta
                  vmem, vmem, vmem, vmem],   # head w/b, row scale/shift
        out_specs=vmem,
    )


# --------------------------------------------------------------------------- parameters
def _unif(key, shape, fan_in):
    bound = 1.0 / math.sqrt(fan_in)
    return jax.random.uniform(key, shape, jnp.float32, -bound, bound)


def init_params(key, cfg):
    C, F, plen = cfg.d_model, cfg.d_ff, cfg.patch_ks
    patch_num = (cfg.seq_len - plen) // cfg.patch_sd + 1
    if cfg.padding_patch == "end":
        patch_num += 1
    keys = iter(jax.random.split(key, 64))

    params = {
        # RevIN affine
        "revin_w": jnp.ones((cfg.enc_in,), jnp.float32),
        "revin_b": jnp.zeros((cfg.enc_in,), jnp.float32),
        # deformable-patch offset predictor (zero init == rigid patching at init)
        "off_w": jnp.zeros((plen, plen), jnp.float32),
        "off_b": jnp.zeros((plen,), jnp.float32),
        # patch embedding W_P : Linear(patch_len -> d_model)
        "wp_w": _unif(next(keys), (plen, C), plen),
        "wp_b": _unif(next(keys), (C,), plen),
        # flatten head : Linear(d_model * patch_num -> pred_len), row index = c*P + l
        "head_w": _unif(next(keys), (C * patch_num, cfg.pred_len), C * patch_num),
        "head_b": _unif(next(keys), (cfg.pred_len,), C * patch_num),
        "layers": [],
    }

    for K in cfg.dw_ks:
        sk = cfg.re_param_kernel
        # re-param depthwise conv: large kernel + centered small kernel, merged (same math)
        wl = _unif(next(keys), (C, K), K)
        bl = _unif(next(keys), (C,), K)
        ws = _unif(next(keys), (C, sk), sk)
        bs = _unif(next(keys), (C,), sk)
        left = (K - sk) // 2
        right = (K - sk) - left
        params["layers"].append({
            "dw_w": wl + jnp.pad(ws, ((0, 0), (left, right))),      # [C, K] merged
            "dw_b": bl + bs,                                        # [C]
            "bn1_w": jnp.ones((C,), jnp.float32),
            "bn1_b": jnp.zeros((C,), jnp.float32),
            "ff1_w": _unif(next(keys), (C, F), C),
            "ff1_b": _unif(next(keys), (F,), C),
            "ff2_w": _unif(next(keys), (F, C), F),
            "ff2_b": _unif(next(keys), (C,), F),
            "bn2_w": jnp.ones((C,), jnp.float32),
            "bn2_b": jnp.zeros((C,), jnp.float32),
            "a1": jnp.float32(1e-8),                                # res-param scalars
            "a2": jnp.float32(1e-8),
        })
    return params


def prepare_weights(params, cfg):
    """Static weight packing, run ONCE outside the per-step jit (hoisted per review)."""
    C, F, plen, pred = cfg.d_model, cfg.d_ff, cfg.patch_ks, cfg.pred_len
    P = (cfg.seq_len - plen) // cfg.patch_sd + 1 + (1 if cfg.padding_patch == "end" else 0)
    k_max = max(cfg.dw_ks)

    tapw, dwb, b1g, b1b, b2g, b2b = [], [], [], [], [], []
    f1w, f1b, f2w, f2b, alphas = [], [], [], [], []
    l_idx = jnp.arange(P)
    for lyr, K in zip(params["layers"], cfg.dw_ks):
        pad = (K - 1) // 2
        # per-tap lane vectors: tapw[k, l*C + c] = dw_w[c, k] masked by the 'same' zero-pad
        pos = l_idx[:, None] + jnp.arange(K)[None, :] - pad                 # [P, K]
        valid = ((pos >= 0) & (pos < P)).astype(jnp.float32)                # [P, K]
        tw = (valid.T[:, :, None] * lyr["dw_w"].T[:, None, :]).reshape(K, P * C)
        tapw.append(jnp.pad(tw, ((0, k_max - K), (0, 0))))
        dwb.append(jnp.tile(lyr["dw_b"], P))
        b1g.append(jnp.tile(lyr["bn1_w"], P)); b1b.append(jnp.tile(lyr["bn1_b"], P))
        b2g.append(jnp.tile(lyr["bn2_w"], P)); b2b.append(jnp.tile(lyr["bn2_b"], P))
        f1w.append(lyr["ff1_w"].astype(jnp.bfloat16)); f1b.append(lyr["ff1_b"])
        f2w.append(lyr["ff2_w"].astype(jnp.bfloat16)); f2b.append(lyr["ff2_b"])
        alphas.append(jnp.stack([lyr["a1"], lyr["a2"]]))

    # head: permute rows from torch's (c*P + l) flatten order to our (l*C + c) layout
    head_w = (params["head_w"].reshape(C, P, pred).transpose(1, 0, 2)
              .reshape(P * C, pred).astype(jnp.bfloat16))

    return {
        "wp_w": params["wp_w"].astype(jnp.bfloat16),         # [plen, C]  bf16
        "wp_b": params["wp_b"].reshape(1, C),
        "tapw": jnp.concatenate(tapw, axis=0),               # [n_layers*k_max, P*C] f32
        "dwb": jnp.stack(dwb),                               # [n_layers, P*C]
        "alphas": jnp.stack(alphas),                         # [n_layers, 2] -> SMEM
        "b1g": jnp.stack(b1g), "b1b": jnp.stack(b1b),
        "f1w": jnp.stack(f1w), "f1b": jnp.stack(f1b),
        "f2w": jnp.stack(f2w), "f2b": jnp.stack(f2b),
        "b2g": jnp.stack(b2g), "b2b": jnp.stack(b2b),
        "head_w": head_w, "head_b": params["head_b"].reshape(1, pred),
        "revin_w": params["revin_w"], "revin_b": params["revin_b"],
        "off_w": params["off_w"], "off_b": params["off_b"],
    }


# ------------------------------------------------------------------------------ forward
def forward(x, prep, cfg):
    B, T, Cin = x.shape
    stride, plen = cfg.patch_sd, cfg.patch_ks
    C, pred = cfg.d_model, cfg.pred_len
    P = (T - plen) // stride + 1 + (1 if cfg.padding_patch == "end" else 0)
    N = B * Cin
    k_max = max(cfg.dw_ks)

    # ---- RevIN 'norm' (Model/backbone permutes cancel: stats over the time axis of x)
    mean = jnp.mean(x, axis=1, keepdims=True)                       # [B,1,Cin]
    stdev = jnp.sqrt(jnp.var(x, axis=1, keepdims=True) + 1e-5)      # biased var, eps=1e-5
    xn = (x - mean) / stdev * prep["revin_w"] + prep["revin_b"]
    z = jnp.transpose(xn, (0, 2, 1))                                # [B, Cin, T]

    # ---- padding_patch == 'end': ReplicationPad1d((0, stride))
    z = jnp.concatenate([z, jnp.repeat(z[:, :, -1:], stride, axis=-1)], axis=-1)
    Lp = T + stride

    # ---- rigid patching via static slices (no XLA gather)
    rigid = jnp.stack([z[:, :, p * stride:p * stride + plen] for p in range(P)], axis=2)

    # ---- deformable sampling: offset net + gather-free linear interpolation (one-hot)
    # TODO(synk): the original DepatchSampling offset network isn't in the provided
    #             snippet; a zero-initialized linear offset predictor stands in for it
    #             (identical to rigid patching at init).
    off = rigid @ prep["off_w"] + prep["off_b"]                     # [B,Cin,P,plen]
    idx = (jnp.arange(P)[:, None] * stride + jnp.arange(plen)[None, :]).astype(jnp.float32)
    pos = jnp.clip(idx + off, 0.0, float(Lp - 1))
    i0 = jnp.floor(pos)
    frac = pos - i0
    i0i = i0.astype(jnp.int32)
    i1i = jnp.minimum(i0i + 1, Lp - 1)
    lgrid = jnp.arange(Lp, dtype=jnp.int32)
    w_int = ((i0i[..., None] == lgrid).astype(jnp.float32) * (1.0 - frac)[..., None]
             + (i1i[..., None] == lgrid).astype(jnp.float32) * frac[..., None])
    patches = jnp.einsum('bvpjl,bvl->bvpj', w_int, z)               # [B,Cin,P,plen]
    # row index = l*N + n (n = b*Cin + v): the ordering the kernel's row-stacked view uses
    patches_rows = jnp.transpose(patches, (2, 0, 1, 3)).reshape(P * N, plen)

    # ---- RevIN 'denorm' folded into a per-row affine applied inside the kernel
    scale = stdev[:, 0, :] / (prep["revin_w"] + 1e-5 * 1e-5)        # [B, Cin]
    shift = mean[:, 0, :] - prep["revin_b"] * scale
    row_scale = scale.reshape(N, 1)
    row_shift = shift.reshape(N, 1)

    fused = _make_fused_backbone(N=N, P=P, C=C, plen=plen, pred=pred,
                                 dw_ks=tuple(cfg.dw_ks), k_max=k_max)
    y = fused(patches_rows,
              prep["wp_w"], prep["wp_b"],
              prep["tapw"], prep["dwb"], prep["alphas"],
              prep["b1g"], prep["b1b"],
              prep["f1w"], prep["f1b"], prep["f2w"], prep["f2b"],
              prep["b2g"], prep["b2b"],
              prep["head_w"], prep["head_b"], row_scale, row_shift)  # [N, pred]

    y = y.reshape(B, Cin, pred)
    return jnp.transpose(y, (0, 2, 1))                              # [B, pred_len, enc_in]


# --------------------------------------------------------------------------------- main
if __name__ == "__main__":
    cfg = Configs()
    key = jax.random.PRNGKey(0)
    kx, kp = jax.random.split(key)

    x = jax.random.normal(kx, (2, cfg.seq_len, cfg.enc_in), jnp.float32)
    params = init_params(kp, cfg)
    prep = prepare_weights(params, cfg)     # hoisted: computed once, not per step

    fwd = jax.jit(functools.partial(forward, cfg=cfg))
    out = jax.block_until_ready(fwd(x, prep))

    assert out.shape == (2, cfg.pred_len, cfg.enc_in), out.shape
    assert bool(jnp.all(jnp.isfinite(out)))
    print("KERNEL_OK")
</pallas_src>

<mosaic_0001>
module attributes {stable_mosaic.version = 11 : i64} {
  func.func @kernel(%arg0: memref<64x4xf32, #tpu.memory_space<vmem>>, %arg1: memref<4x32xbf16, #tpu.memory_space<vmem>>, %arg2: memref<1x32xf32, #tpu.memory_space<vmem>>, %arg3: memref<26x256xf32, #tpu.memory_space<vmem>>, %arg4: memref<2x256xf32, #tpu.memory_space<vmem>>, %arg5: memref<2x2xf32, #tpu.memory_space<smem>>, %arg6: memref<2x256xf32, #tpu.memory_space<vmem>>, %arg7: memref<2x256xf32, #tpu.memory_space<vmem>>, %arg8: memref<2x32x64xbf16, #tpu.memory_space<vmem>>, %arg9: memref<2x64xf32, #tpu.memory_space<vmem>>, %arg10: memref<2x64x32xbf16, #tpu.memory_space<vmem>>, %arg11: memref<2x32xf32, #tpu.memory_space<vmem>>, %arg12: memref<2x256xf32, #tpu.memory_space<vmem>>, %arg13: memref<2x256xf32, #tpu.memory_space<vmem>>, %arg14: memref<256x8xbf16, #tpu.memory_space<vmem>>, %arg15: memref<1x8xf32, #tpu.memory_space<vmem>>, %arg16: memref<8x1xf32, #tpu.memory_space<vmem>>, %arg17: memref<8x1xf32, #tpu.memory_space<vmem>>, %arg18: memref<8x8xf32, #tpu.memory_space<vmem>>) attributes {dimension_semantics = [], scalar_prefetch = 0 : i64, scratch_operands = 0 : i64, tpu.core_type = #tpu.core_type<tc>} {
    %c0 = arith.constant 0 : index
    %c0_0 = arith.constant 0 : index
    %0 = vector.load %arg0[%c0, %c0_0] : memref<64x4xf32, #tpu.memory_space<vmem>>, vector<64x4xf32>
    %1 = arith.truncf %0 : vector<64x4xf32> to vector<64x4xbf16>
    %c0_1 = arith.constant 0 : index
    %c0_2 = arith.constant 0 : index
    %2 = vector.load %arg1[%c0_1, %c0_2] : memref<4x32xbf16, #tpu.memory_space<vmem>>, vector<4x32xbf16>
    %cst = arith.constant dense<0.000000e+00> : vector<64x32xf32>
    %3 = tpu.matmul %1, %2, %cst {dimension_numbers = #tpu.dot_dimension_numbers<[1], [0], [0], [1], [0, 0, 1, 1], [], []>} : vector<64x4xbf16>, vector<4x32xbf16>, vector<64x32xf32> -> vector<64x32xf32>
    %c0_3 = arith.constant 0 : index
    %c0_4 = arith.constant 0 : index
    %4 = vector.load %arg2[%c0_3, %c0_4] : memref<1x32xf32, #tpu.memory_space<vmem>>, vector<1x32xf32>
    %5 = vector.broadcast %4 : vector<1x32xf32> to vector<64x32xf32>
    %6 = arith.addf %3, %5 : vector<64x32xf32>
    %7 = vector.extract_strided_slice %6 {offsets = [0, 0], sizes = [8, 32], strides = [1, 1]} : vector<64x32xf32> to vector<8x32xf32>
    %8 = vector.extract_strided_slice %6 {offsets = [8, 0], sizes = [8, 32], strides = [1, 1]} : vector<64x32xf32> to vector<8x32xf32>
    %9 = vector.extract_strided_slice %6 {offsets = [16, 0], sizes = [8, 32], strides = [1, 1]} : vector<64x32xf32> to vector<8x32xf32>
    %10 = vector.extract_strided_slice %6 {offsets = [24, 0], sizes = [8, 32], strides = [1, 1]} : vector<64x32xf32> to vector<8x32xf32>
    %11 = vector.extract_strided_slice %6 {offsets = [32, 0], sizes = [8, 32], strides = [1, 1]} : vector<64x32xf32> to vector<8x32xf32>
    %12 = vector.extract_strided_slice %6 {offsets = [40, 0], sizes = [8, 32], strides = [1, 1]} : vector<64x32xf32> to vector<8x32xf32>
    %13 = vector.extract_strided_slice %6 {offsets = [48, 0], sizes = [8, 32], strides = [1, 1]} : vector<64x32xf32> to vector<8x32xf32>
    %14 = vector.extract_strided_slice %6 {offsets = [56, 0], sizes = [8, 32], strides = [1, 1]} : vector<64x32xf32> to vector<8x32xf32>
    %15 = tpu.concatenate %7, %8, %9, %10, %11, %12, %13, %14 in 1 : vector<8x32xf32>, vector<8x32xf32>, vector<8x32xf32>, vector<8x32xf32>, vector<8x32xf32>, vector<8x32xf32>, vector<8x32xf32>, vector<8x32xf32> -> vector<8x256xf32>
    %c3 = arith.constant 3 : index
    %c0_5 = arith.constant 0 : index
    %16 = vector.load %arg3[%c3, %c0_5] : memref<26x256xf32, #tpu.memory_space<vmem>>, vector<1x256xf32>
    %17 = vector.broadcast %16 : vector<1x256xf32> to vector<8x256xf32>
    %18 = arith.mulf %15, %17 : vector<8x256xf32>
    %c96_i32 = arith.constant 96 : i32
    %19 = tpu.dynamic_rotate %15 by %c96_i32 dim 1 : vector<8x256xf32>, i32 -> vector<8x256xf32>
    %c0_6 = arith.constant 0 : index
    %c0_7 = arith.constant 0 : index
    %20 = vector.load %arg3[%c0_6, %c0_7] : memref<26x256xf32, #tpu.memory_space<vmem>>, vector<1x256xf32>
    %21 = vector.broadcast %20 : vector<1x256xf32> to vector<8x256xf32>
    %22 = arith.mulf %19, %21 : vector<8x256xf32>
    %23 = arith.addf %18, %22 : vector<8x256xf32>
    %c64_i32 = arith.constant 64 : i32
    %24 = tpu.dynamic_rotate %15 by %c64_i32 dim 1 : vector<8x256xf32>, i32 -> vector<8x256xf32>
    %c1 = arith.constant 1 : index
    %c0_8 = arith.constant 0 : index
    %25 = vector.load %arg3[%c1, %c0_8] : memref<26x256xf32, #tpu.memory_space<vmem>>, vector<1x256xf32>
    %26 = vector.broadcast %25 : vector<1x256xf32> to vector<8x256xf32>
    %27 = arith.mulf %24, %26 : vector<8x256xf32>
    %28 = arith.addf %23, %27 : vector<8x256xf32>
    %c32_i32 = arith.constant 32 : i32
    %29 = tpu.dynamic_rotate %15 by %c32_i32 dim 1 : vector<8x256xf32>, i32 -> vector<8x256xf32>
    %c2 = arith.constant 2 : index
    %c0_9 = arith.constant 0 : index
    %30 = vector.load %arg3[%c2, %c0_9] : memref<26x256xf32, #tpu.memory_space<vmem>>, vector<1x256xf32>
    %31 = vector.broadcast %30 : vector<1x256xf32> to vector<8x256xf32>
    %32 = arith.mulf %29, %31 : vector<8x256xf32>
    %33 = arith.addf %28, %32 : vector<8x256xf32>
    %c224_i32 = arith.constant 224 : i32
    %34 = tpu.dynamic_rotate %15 by %c224_i32 dim 1 : vector<8x256xf32>, i32 -> vector<8x256xf32>
    %c4 = arith.constant 4 : index
    %c0_10 = arith.constant 0 : index
    %35 = vector.load %arg3[%c4, %c0_10] : memref<26x256xf32, #tpu.memory_space<vmem>>, vector<1x256xf32>
    %36 = vector.broadcast %35 : vector<1x256xf32> to vector<8x256xf32>
    %37 = arith.mulf %34, %36 : vector<8x256xf32>
    %38 = arith.addf %33, %37 : vector<8x256xf32>
    %c192_i32 = arith.constant 192 : i32
    %39 = tpu.dynamic_rotate %15 by %c192_i32 dim 1 : vector<8x256xf32>, i32 -> vector<8x256xf32>
    %c5 = arith.constant 5 : index
    %c0_11 = arith.constant 0 : index
    %40 = vector.load %arg3[%c5, %c0_11] : memref<26x256xf32, #tpu.memory_space<vmem>>, vector<1x256xf32>
    %41 = vector.broadcast %40 : vector<1x256xf32> to vector<8x256xf32>
    %42 = arith.mulf %39, %41 : vector<8x256xf32>
    %43 = arith.addf %38, %42 : vector<8x256xf32>
    %c160_i32 = arith.constant 160 : i32
    %44 = tpu.dynamic_rotate %15 by %c160_i32 dim 1 : vector<8x256xf32>, i32 -> vector<8x256xf32>
    %c6 = arith.constant 6 : index
    %c0_12 = arith.constant 0 : index
    %45 = vector.load %arg3[%c6, %c0_12] : memref<26x256xf32, #tpu.memory_space<vmem>>, vector<1x256xf32>
    %46 = vector.broadcast %45 : vector<1x256xf32> to vector<8x256xf32>
    %47 = arith.mulf %44, %46 : vector<8x256xf32>
    %48 = arith.addf %43, %47 : vector<8x256xf32>
    %c0_13 = arith.constant 0 : index
    %c0_14 = arith.constant 0 : index
    %49 = vector.load %arg4[%c0_13, %c0_14] : memref<2x256xf32, #tpu.memory_space<vmem>>, vector<1x256xf32>
    %50 = vector.broadcast %49 : vector<1x256xf32> to vector<8x256xf32>
    %51 = arith.addf %48, %50 : vector<8x256xf32>
    %c0_15 = arith.constant 0 : index
    %c0_16 = arith.constant 0 : index
    %52 = memref.load %arg5[%c0_15, %c0_16] : memref<2x2xf32, #tpu.memory_space<smem>>
    %cst_17 = arith.constant 5.000000e-01 : f32
    %53 = vector.broadcast %cst_17 : f32 to vector<8x256xf32>
    %54 = arith.mulf %53, %51 : vector<8x256xf32>
    %cst_18 = arith.constant 4.471500e-02 : f32
    %55 = vector.broadcast %cst_18 : f32 to vector<8x256xf32>
    %56 = arith.mulf %55, %51 : vector<8x256xf32>
    %57 = arith.mulf %56, %51 : vector<8x256xf32>
    %58 = arith.mulf %57, %51 : vector<8x256xf32>
    %59 = arith.addf %51, %58 : vector<8x256xf32>
    %cst_19 = arith.constant 0.797884583 : f32
    %60 = vector.broadcast %cst_19 : f32 to vector<8x256xf32>
    %61 = arith.mulf %60, %59 : vector<8x256xf32>
    %62 = math.tanh %61 : vector<8x256xf32>
    %cst_20 = arith.constant 1.000000e+00 : f32
    %63 = vector.broadcast %cst_20 : f32 to vector<8x256xf32>
    %64 = arith.addf %63, %62 : vector<8x256xf32>
    %65 = arith.mulf %54, %64 : vector<8x256xf32>
    %66 = vector.broadcast %52 : f32 to vector<8x256xf32>
    %67 = arith.mulf %66, %65 : vector<8x256xf32>
    %68 = arith.addf %15, %67 : vector<8x256xf32>
    %c0_21 = arith.constant 0 : index
    %c0_22 = arith.constant 0 : index
    %69 = vector.load %arg6[%c0_21, %c0_22] : memref<2x256xf32, #tpu.memory_space<vmem>>, vector<1x256xf32>
    %c0_23 = arith.constant 0 : index
    %c0_24 = arith.constant 0 : index
    %70 = vector.load %arg7[%c0_23, %c0_24] : memref<2x256xf32, #tpu.memory_space<vmem>>, vector<1x256xf32>
    %cst_25 = arith.constant dense<0.000000e+00> : vector<256xf32>
    %71 = vector.multi_reduction <add>, %68, %cst_25 [0] : vector<8x256xf32> to vector<256xf32>
    %72 = vector.shape_cast %71 : vector<256xf32> to vector<1x256xf32>
    %73 = arith.mulf %68, %68 : vector<8x256xf32>
    %cst_26 = arith.constant dense<0.000000e+00> : vector<256xf32>
    %74 = vector.multi_reduction <add>, %73, %cst_26 [0] : vector<8x256xf32> to vector<256xf32>
    %75 = vector.shape_cast %74 : vector<256xf32> to vector<1x256xf32>
    %76 = tpu.concatenate %72, %75 in 0 : vector<1x256xf32>, vector<1x256xf32> -> vector<2x256xf32>
    %c32_i32_27 = arith.constant 32 : i32
    %77 = tpu.dynamic_rotate %76 by %c32_i32_27 dim 1 : vector<2x256xf32>, i32 -> vector<2x256xf32>
    %78 = arith.addf %76, %77 : vector<2x256xf32>
    %c64_i32_28 = arith.constant 64 : i32
    %79 = tpu.dynamic_rotate %78 by %c64_i32_28 dim 1 : vector<2x256xf32>, i32 -> vector<2x256xf32>
    %80 = arith.addf %78, %79 : vector<2x256xf32>
    %c128_i32 = arith.constant 128 : i32
    %81 = tpu.dynamic_rotate %80 by %c128_i32 dim 1 : vector<2x256xf32>, i32 -> vector<2x256xf32>
    %82 = arith.addf %80, %81 : vector<2x256xf32>
    %83 = vector.extract_strided_slice %82 {offsets = [0, 0], sizes = [1, 256], strides = [1, 1]} : vector<2x256xf32> to vector<1x256xf32>
    %cst_29 = arith.constant 1.562500e-02 : f32
    %84 = vector.broadcast %cst_29 : f32 to vector<1x256xf32>
    %85 = arith.mulf %83, %84 : vector<1x256xf32>
    %86 = vector.extract_strided_slice %82 {offsets = [1, 0], sizes = [1, 256], strides = [1, 1]} : vector<2x256xf32> to vector<1x256xf32>
    %cst_30 = arith.constant 1.562500e-02 : f32
    %87 = vector.broadcast %cst_30 : f32 to vector<1x256xf32>
    %88 = arith.mulf %86, %87 : vector<1x256xf32>
    %89 = arith.mulf %85, %85 : vector<1x256xf32>
    %90 = arith.subf %88, %89 : vector<1x256xf32>
    %91 = vector.broadcast %85 : vector<1x256xf32> to vector<8x256xf32>
    %92 = arith.subf %68, %91 : vector<8x256xf32>
    %cst_31 = arith.constant 9.99999974E-6 : f32
    %93 = vector.broadcast %cst_31 : f32 to vector<1x256xf32>
    %94 = arith.addf %90, %93 : vector<1x256xf32>
    %95 = math.rsqrt %94 : vector<1x256xf32>
    %96 = vector.broadcast %95 : vector<1x256xf32> to vector<8x256xf32>
    %97 = arith.mulf %92, %96 : vector<8x256xf32>
    %98 = vector.broadcast %69 : vector<1x256xf32> to vector<8x256xf32>
    %99 = arith.mulf %97, %98 : vector<8x256xf32>
    %100 = vector.broadcast %70 : vector<1x256xf32> to vector<8x256xf32>
    %101 = arith.addf %99, %100 : vector<8x256xf32>
    %102 = vector.extract_strided_slice %101 {offsets = [0, 0], sizes = [8, 32], strides = [1, 1]} : vector<8x256xf32> to vector<8x32xf32>
    %103 = vector.extract_strided_slice %101 {offsets = [0, 32], sizes = [8, 32], strides = [1, 1]} : vector<8x256xf32> to vector<8x32xf32>
    %104 = vector.extract_strided_slice %101 {offsets = [0, 64], sizes = [8, 32], strides = [1, 1]} : vector<8x256xf32> to vector<8x32xf32>
    %105 = vector.extract_strided_slice %101 {offsets = [0, 96], sizes = [8, 32], strides = [1, 1]} : vector<8x256xf32> to vector<8x32xf32>
    %106 = vector.extract_strided_slice %101 {offsets = [0, 128], sizes = [8, 32], strides = [1, 1]} : vector<8x256xf32> to vector<8x32xf32>
    %107 = vector.extract_strided_slice %101 {offsets = [0, 160], sizes = [8, 32], strides = [1, 1]} : vector<8x256xf32> to vector<8x32xf32>
    %108 = vector.extract_strided_slice %101 {offsets = [0, 192], sizes = [8, 32], strides = [1, 1]} : vector<8x256xf32> to vector<8x32xf32>
    %109 = vector.extract_strided_slice %101 {offsets = [0, 224], sizes = [8, 32], strides = [1, 1]} : vector<8x256xf32> to vector<8x32xf32>
    %110 = tpu.concatenate %102, %103, %104, %105, %106, %107, %108, %109 in 0 : vector<8x32xf32>, vector<8x32xf32>, vector<8x32xf32>, vector<8x32xf32>, vector<8x32xf32>, vector<8x32xf32>, vector<8x32xf32>, vector<8x32xf32> -> vector<64x32xf32>
    %111 = arith.truncf %110 : vector<64x32xf32> to vector<64x32xbf16>
    %c0_32 = arith.constant 0 : index
    %c0_33 = arith.constant 0 : index
    %c0_34 = arith.constant 0 : index
    %112 = vector.load %arg8[%c0_32, %c0_33, %c0_34] : memref<2x32x64xbf16, #tpu.memory_space<vmem>>, vector<1x32x64xbf16>
    %113 = vector.shape_cast %112 : vector<1x32x64xbf16> to vector<32x64xbf16>
    %cst_35 = arith.constant dense<0.000000e+00> : vector<64x64xf32>
    %114 = tpu.matmul %111, %113, %cst_35 {dimension_numbers = #tpu.dot_dimension_numbers<[1], [0], [0], [1], [0, 0, 1, 1], [], []>} : vector<64x32xbf16>, vector<32x64xbf16>, vector<64x64xf32> -> vector<64x64xf32>
    %c0_36 = arith.constant 0 : index
    %c0_37 = arith.constant 0 : index
    %115 = vector.load %arg9[%c0_36, %c0_37] : memref<2x64xf32, #tpu.memory_space<vmem>>, vector<1x64xf32>
    %116 = vector.broadcast %115 : vector<1x64xf32> to vector<64x64xf32>
    %117 = arith.addf %114, %116 : vector<64x64xf32>
    %cst_38 = arith.constant 5.000000e-01 : f32
    %118 = vector.broadcast %cst_38 : f32 to vector<64x64xf32>
    %119 = arith.mulf %118, %117 : vector<64x64xf32>
    %cst_39 = arith.constant 4.471500e-02 : f32
    %120 = vector.broadcast %cst_39 : f32 to vector<64x64xf32>
    %121 = arith.mulf %120, %117 : vector<64x64xf32>
    %122 = arith.mulf %121, %117 : vector<64x64xf32>
    %123 = arith.mulf %122, %117 : vector<64x64xf32>
    %124 = arith.addf %117, %123 : vector<64x64xf32>
    %cst_40 = arith.constant 0.797884583 : f32
    %125 = vector.broadcast %cst_40 : f32 to vector<64x64xf32>
    %126 = arith.mulf %125, %124 : vector<64x64xf32>
    %127 = math.tanh %126 : vector<64x64xf32>
    %cst_41 = arith.constant 1.000000e+00 : f32
    %128 = vector.broadcast %cst_41 : f32 to vector<64x64xf32>
    %129 = arith.addf %128, %127 : vector<64x64xf32>
    %130 = arith.mulf %119, %129 : vector<64x64xf32>
    %131 = arith.truncf %130 : vector<64x64xf32> to vector<64x64xbf16>
    %c0_42 = arith.constant 0 : index
    %c0_43 = arith.constant 0 : index
    %c0_44 = arith.constant 0 : index
    %132 = vector.load %arg10[%c0_42, %c0_43, %c0_44] : memref<2x64x32xbf16, #tpu.memory_space<vmem>>, vector<1x64x32xbf16>
    %133 = vector.shape_cast %132 : vector<1x64x32xbf16> to vector<64x32xbf16>
    %cst_45 = arith.constant dense<0.000000e+00> : vector<64x32xf32>
    %134 = tpu.matmul %131, %133, %cst_45 {dimension_numbers = #tpu.dot_dimension_numbers<[1], [0], [0], [1], [0, 0, 1, 1], [], []>} : vector<64x64xbf16>, vector<64x32xbf16>, vector<64x32xf32> -> vector<64x32xf32>
    %c0_46 = arith.constant 0 : index
    %c0_47 = arith.constant 0 : index
    %135 = vector.load %arg11[%c0_46, %c0_47] : memref<2x32xf32, #tpu.memory_space<vmem>>, vector<1x32xf32>
    %136 = vector.broadcast %135 : vector<1x32xf32> to vector<64x32xf32>
    %137 = arith.addf %134, %136 : vector<64x32xf32>
    %c0_48 = arith.constant 0 : index
    %c1_49 = arith.constant 1 : index
    %138 = memref.load %arg5[%c0_48, %c1_49] : memref<2x2xf32, #tpu.memory_space<smem>>
    %139 = vector.extract_strided_slice %137 {offsets = [0, 0], sizes = [8, 32], strides = [1, 1]} : vector<64x32xf32> to vector<8x32xf32>
    %140 = vector.extract_strided_slice %137 {offsets = [8, 0], sizes = [8, 32], strides = [1, 1]} : vector<64x32xf32> to vector<8x32xf32>
    %141 = vector.extract_strided_slice %137 {offsets = [16, 0], sizes = [8, 32], strides = [1, 1]} : vector<64x32xf32> to vector<8x32xf32>
    %142 = vector.extract_strided_slice %137 {offsets = [24, 0], sizes = [8, 32], strides = [1, 1]} : vector<64x32xf32> to vector<8x32xf32>
    %143 = vector.extract_strided_slice %137 {offsets = [32, 0], sizes = [8, 32], strides = [1, 1]} : vector<64x32xf32> to vector<8x32xf32>
    %144 = vector.extract_strided_slice %137 {offsets = [40, 0], sizes = [8, 32], strides = [1, 1]} : vector<64x32xf32> to vector<8x32xf32>
    %145 = vector.extract_strided_slice %137 {offsets = [48, 0], sizes = [8, 32], strides = [1, 1]} : vector<64x32xf32> to vector<8x32xf32>
    %146 = vector.extract_strided_slice %137 {offsets = [56, 0], sizes = [8, 32], strides = [1, 1]} : vector<64x32xf32> to vector<8x32xf32>
    %147 = tpu.concatenate %139, %140, %141, %142, %143, %144, %145, %146 in 1 : vector<8x32xf32>, vector<8x32xf32>, vector<8x32xf32>, vector<8x32xf32>, vector<8x32xf32>, vector<8x32xf32>, vector<8x32xf32>, vector<8x32xf32> -> vector<8x256xf32>
    %148 = vector.broadcast %138 : f32 to vector<8x256xf32>
    %149 = arith.mulf %148, %147 : vector<8x256xf32>
    %150 = arith.addf %101, %149 : vector<8x256xf32>
    %c0_50 = arith.constant 0 : index
    %c0_51 = arith.constant 0 : index
    %151 = vector.load %arg12[%c0_50, %c0_51] : memref<2x256xf32, #tpu.memory_space<vmem>>, vector<1x256xf32>
    %c0_52 = arith.constant 0 : index
    %c0_53 = arith.constant 0 : index
    %152 = vector.load %arg13[%c0_52, %c0_53] : memref<2x256xf32, #tpu.memory_space<vmem>>, vector<1x256xf32>
    %cst_54 = arith.constant dense<0.000000e+00> : vector<256xf32>
    %153 = vector.multi_reduction <add>, %150, %cst_54 [0] : vector<8x256xf32> to vector<256xf32>
    %154 = vector.shape_cast %153 : vector<256xf32> to vector<1x256xf32>
    %155 = arith.mulf %150, %150 : vector<8x256xf32>
    %cst_55 = arith.constant dense<0.000000e+00> : vector<256xf32>
    %156 = vector.multi_reduction <add>, %155, %cst_55 [0] : vector<8x256xf32> to vector<256xf32>
    %157 = vector.shape_cast %156 : vector<256xf32> to vector<1x256xf32>
    %158 = tpu.concatenate %154, %157 in 0 : vector<1x256xf32>, vector<1x256xf32> -> vector<2x256xf32>
    %c32_i32_56 = arith.constant 32 : i32
    %159 = tpu.dynamic_rotate %158 by %c32_i32_56 dim 1 : vector<2x256xf32>, i32 -> vector<2x256xf32>
    %160 = arith.addf %158, %159 : vector<2x256xf32>
    %c64_i32_57 = arith.constant 64 : i32
    %161 = tpu.dynamic_rotate %160 by %c64_i32_57 dim 1 : vector<2x256xf32>, i32 -> vector<2x256xf32>
    %162 = arith.addf %160, %161 : vector<2x256xf32>
    %c128_i32_58 = arith.constant 128 : i32
    %163 = tpu.dynamic_rotate %162 by %c128_i32_58 dim 1 : vector<2x256xf32>, i32 -> vector<2x256xf32>
    %164 = arith.addf %162, %163 : vector<2x256xf32>
    %165 = vector.extract_strided_slice %164 {offsets = [0, 0], sizes = [1, 256], strides = [1, 1]} : vector<2x256xf32> to vector<1x256xf32>
    %cst_59 = arith.constant 1.562500e-02 : f32
    %166 = vector.broadcast %cst_59 : f32 to vector<1x256xf32>
    %167 = arith.mulf %165, %166 : vector<1x256xf32>
    %168 = vector.extract_strided_slice %164 {offsets = [1, 0], sizes = [1, 256], strides = [1, 1]} : vector<2x256xf32> to vector<1x256xf32>
    %cst_60 = arith.constant 1.562500e-02 : f32
    %169 = vector.broadcast %cst_60 : f32 to vector<1x256xf32>
    %170 = arith.mulf %168, %169 : vector<1x256xf32>
    %171 = arith.mulf %167, %167 : vector<1x256xf32>
    %172 = arith.subf %170, %171 : vector<1x256xf32>
    %173 = vector.broadcast %167 : vector<1x256xf32> to vector<8x256xf32>
    %174 = arith.subf %150, %173 : vector<8x256xf32>
    %cst_61 = arith.constant 9.99999974E-6 : f32
    %175 = vector.broadcast %cst_61 : f32 to vector<1x256xf32>
    %176 = arith.addf %172, %175 : vector<1x256xf32>
    %177 = math.rsqrt %176 : vector<1x256xf32>
    %178 = vector.broadcast %177 : vector<1x256xf32> to vector<8x256xf32>
    %179 = arith.mulf %174, %178 : vector<8x256xf32>
    %180 = vector.broadcast %151 : vector<1x256xf32> to vector<8x256xf32>
    %181 = arith.mulf %179, %180 : vector<8x256xf32>
    %182 = vector.broadcast %152 : vector<1x256xf32> to vector<8x256xf32>
    %183 = arith.addf %181, %182 : vector<8x256xf32>
    %c19 = arith.constant 19 : index
    %c0_62 = arith.constant 0 : index
    %184 = vector.load %arg3[%c19, %c0_62] : memref<26x256xf32, #tpu.memory_space<vmem>>, vector<1x256xf32>
    %185 = vector.broadcast %184 : vector<1x256xf32> to vector<8x256xf32>
    %186 = arith.mulf %183, %185 : vector<8x256xf32>
    %c192_i32_63 = arith.constant 192 : i32
    %187 = tpu.dynamic_rotate %183 by %c192_i32_63 dim 1 : vector<8x256xf32>, i32 -> vector<8x256xf32>
    %c13 = arith.constant 13 : index
    %c0_64 = arith.constant 0 : index
    %188 = vector.load %arg3[%c13, %c0_64] : memref<26x256xf32, #tpu.memory_space<vmem>>, vector<1x256xf32>
    %189 = vector.broadcast %188 : vector<1x256xf32> to vector<8x256xf32>
    %190 = arith.mulf %187, %189 : vector<8x256xf32>
    %191 = arith.addf %186, %190 : vector<8x256xf32>
    %c160_i32_65 = arith.constant 160 : i32
    %192 = tpu.dynamic_rotate %183 by %c160_i32_65 dim 1 : vector<8x256xf32>, i32 -> vector<8x256xf32>
    %c14 = arith.constant 14 : index
    %c0_66 = arith.constant 0 : index
    %193 = vector.load %arg3[%c14, %c0_66] : memref<26x256xf32, #tpu.memory_space<vmem>>, vector<1x256xf32>
    %194 = vector.broadcast %193 : vector<1x256xf32> to vector<8x256xf32>
    %195 = arith.mulf %192, %194 : vector<8x256xf32>
    %196 = arith.addf %191, %195 : vector<8x256xf32>
    %c128_i32_67 = arith.constant 128 : i32
    %197 = tpu.dynamic_rotate %183 by %c128_i32_67 dim 1 : vector<8x256xf32>, i32 -> vector<8x256xf32>
    %c15 = arith.constant 15 : index
    %c0_68 = arith.constant 0 : index
    %198 = vector.load %arg3[%c15, %c0_68] : memref<26x256xf32, #tpu.memory_space<vmem>>, vector<1x256xf32>
    %199 = vector.broadcast %198 : vector<1x256xf32> to vector<8x256xf32>
    %200 = arith.mulf %197, %199 : vector<8x256xf32>
    %201 = arith.addf %196, %200 : vector<8x256xf32>
    %c96_i32_69 = arith.constant 96 : i32
    %202 = tpu.dynamic_rotate %183 by %c96_i32_69 dim 1 : vector<8x256xf32>, i32 -> vector<8x256xf32>
    %c16 = arith.constant 16 : index
    %c0_70 = arith.constant 0 : index
    %203 = vector.load %arg3[%c16, %c0_70] : memref<26x256xf32, #tpu.memory_space<vmem>>, vector<1x256xf32>
    %204 = vector.broadcast %203 : vector<1x256xf32> to vector<8x256xf32>
    %205 = arith.mulf %202, %204 : vector<8x256xf32>
    %206 = arith.addf %201, %205 : vector<8x256xf32>
    %c64_i32_71 = arith.constant 64 : i32
    %207 = tpu.dynamic_rotate %183 by %c64_i32_71 dim 1 : vector<8x256xf32>, i32 -> vector<8x256xf32>
    %c17 = arith.constant 17 : index
    %c0_72 = arith.constant 0 : index
    %208 = vector.load %arg3[%c17, %c0_72] : memref<26x256xf32, #tpu.memory_space<vmem>>, vector<1x256xf32>
    %209 = vector.broadcast %208 : vector<1x256xf32> to vector<8x256xf32>
    %210 = arith.mulf %207, %209 : vector<8x256xf32>
    %211 = arith.addf %206, %210 : vector<8x256xf32>
    %c32_i32_73 = arith.constant 32 : i32
    %212 = tpu.dynamic_rotate %183 by %c32_i32_73 dim 1 : vector<8x256xf32>, i32 -> vector<8x256xf32>
    %c18 = arith.constant 18 : index
    %c0_74 = arith.constant 0 : index
    %213 = vector.load %arg3[%c18, %c0_74] : memref<26x256xf32, #tpu.memory_space<vmem>>, vector<1x256xf32>
    %214 = vector.broadcast %213 : vector<1x256xf32> to vector<8x256xf32>
    %215 = arith.mulf %212, %214 : vector<8x256xf32>
    %216 = arith.addf %211, %215 : vector<8x256xf32>
    %c224_i32_75 = arith.constant 224 : i32
    %217 = tpu.dynamic_rotate %183 by %c224_i32_75 dim 1 : vector<8x256xf32>, i32 -> vector<8x256xf32>
    %c20 = arith.constant 20 : index
    %c0_76 = arith.constant 0 : index
    %218 = vector.load %arg3[%c20, %c0_76] : memref<26x256xf32, #tpu.memory_space<vmem>>, vector<1x256xf32>
    %219 = vector.broadcast %218 : vector<1x256xf32> to vector<8x256xf32>
    %220 = arith.mulf %217, %219 : vector<8x256xf32>
    %221 = arith.addf %216, %220 : vector<8x256xf32>
    %c192_i32_77 = arith.constant 192 : i32
    %222 = tpu.dynamic_rotate %183 by %c192_i32_77 dim 1 : vector<8x256xf32>, i32 -> vector<8x256xf32>
    %c21 = arith.constant 21 : index
    %c0_78 = arith.constant 0 : index
    %223 = vector.load %arg3[%c21, %c0_78] : memref<26x256xf32, #tpu.memory_space<vmem>>, vector<1x256xf32>
    %224 = vector.broadcast %223 : vector<1x256xf32> to vector<8x256xf32>
    %225 = arith.mulf %222, %224 : vector<8x256xf32>
    %226 = arith.addf %221, %225 : vector<8x256xf32>
    %c160_i32_79 = arith.constant 160 : i32
    %227 = tpu.dynamic_rotate %183 by %c160_i32_79 dim 1 : vector<8x256xf32>, i32 -> vector<8x256xf32>
    %c22 = arith.constant 22 : index
    %c0_80 = arith.constant 0 : index
    %228 = vector.load %arg3[%c22, %c0_80] : memref<26x256xf32, #tpu.memory_space<vmem>>, vector<1x256xf32>
    %229 = vector.broadcast %228 : vector<1x256xf32> to vector<8x256xf32>
    %230 = arith.mulf %227, %229 : vector<8x256xf32>
    %231 = arith.addf %226, %230 : vector<8x256xf32>
    %c128_i32_81 = arith.constant 128 : i32
    %232 = tpu.dynamic_rotate %183 by %c128_i32_81 dim 1 : vector<8x256xf32>, i32 -> vector<8x256xf32>
    %c23 = arith.constant 23 : index
    %c0_82 = arith.constant 0 : index
    %233 = vector.load %arg3[%c23, %c0_82] : memref<26x256xf32, #tpu.memory_space<vmem>>, vector<1x256xf32>
    %234 = vector.broadcast %233 : vector<1x256xf32> to vector<8x256xf32>
    %235 = arith.mulf %232, %234 : vector<8x256xf32>
    %236 = arith.addf %231, %235 : vector<8x256xf32>
    %c96_i32_83 = arith.constant 96 : i32
    %237 = tpu.dynamic_rotate %183 by %c96_i32_83 dim 1 : vector<8x256xf32>, i32 -> vector<8x256xf32>
    %c24 = arith.constant 24 : index
    %c0_84 = arith.constant 0 : index
    %238 = vector.load %arg3[%c24, %c0_84] : memref<26x256xf32, #tpu.memory_space<vmem>>, vector<1x256xf32>
    %239 = vector.broadcast %238 : vector<1x256xf32> to vector<8x256xf32>
    %240 = arith.mulf %237, %239 : vector<8x256xf32>
    %241 = arith.addf %236, %240 : vector<8x256xf32>
    %c64_i32_85 = arith.constant 64 : i32
    %242 = tpu.dynamic_rotate %183 by %c64_i32_85 dim 1 : vector<8x256xf32>, i32 -> vector<8x256xf32>
    %c25 = arith.constant 25 : index
    %c0_86 = arith.constant 0 : index
    %243 = vector.load %arg3[%c25, %c0_86] : memref<26x256xf32, #tpu.memory_space<vmem>>, vector<1x256xf32>
    %244 = vector.broadcast %243 : vector<1x256xf32> to vector<8x256xf32>
    %245 = arith.mulf %242, %244 : vector<8x256xf32>
    %246 = arith.addf %241, %245 : vector<8x256xf32>
    %c1_87 = arith.constant 1 : index
    %c0_88 = arith.constant 0 : index
    %247 = vector.load %arg4[%c1_87, %c0_88] : memref<2x256xf32, #tpu.memory_space<vmem>>, vector<1x256xf32>
    %248 = vector.broadcast %247 : vector<1x256xf32> to vector<8x256xf32>
    %249 = arith.addf %246, %248 : vector<8x256xf32>
    %c1_89 = arith.constant 1 : index
    %c0_90 = arith.constant 0 : index
    %250 = memref.load %arg5[%c1_89, %c0_90] : memref<2x2xf32, #tpu.memory_space<smem>>
    %cst_91 = arith.constant 5.000000e-01 : f32
    %251 = vector.broadcast %cst_91 : f32 to vector<8x256xf32>
    %252 = arith.mulf %251, %249 : vector<8x256xf32>
    %cst_92 = arith.constant 4.471500e-02 : f32
    %253 = vector.broadcast %cst_92 : f32 to vector<8x256xf32>
    %254 = arith.mulf %253, %249 : vector<8x256xf32>
    %255 = arith.mulf %254, %249 : vector<8x256xf32>
    %256 = arith.mulf %255, %249 : vector<8x256xf32>
    %257 = arith.addf %249, %256 : vector<8x256xf32>
    %cst_93 = arith.constant 0.797884583 : f32
    %258 = vector.broadcast %cst_93 : f32 to vector<8x256xf32>
    %259 = arith.mulf %258, %257 : vector<8x256xf32>
    %260 = math.tanh %259 : vector<8x256xf32>
    %cst_94 = arith.constant 1.000000e+00 : f32
    %261 = vector.broadcast %cst_94 : f32 to vector<8x256xf32>
    %262 = arith.addf %261, %260 : vector<8x256xf32>
    %263 = arith.mulf %252, %262 : vector<8x256xf32>
    %264 = vector.broadcast %250 : f32 to vector<8x256xf32>
    %265 = arith.mulf %264, %263 : vector<8x256xf32>
    %266 = arith.addf %183, %265 : vector<8x256xf32>
    %c1_95 = arith.constant 1 : index
    %c0_96 = arith.constant 0 : index
    %267 = vector.load %arg6[%c1_95, %c0_96] : memref<2x256xf32, #tpu.memory_space<vmem>>, vector<1x256xf32>
    %c1_97 = arith.constant 1 : index
    %c0_98 = arith.constant 0 : index
    %268 = vector.load %arg7[%c1_97, %c0_98] : memref<2x256xf32, #tpu.memory_space<vmem>>, vector<1x256xf32>
    %cst_99 = arith.constant dense<0.000000e+00> : vector<256xf32>
    %269 = vector.multi_reduction <add>, %266, %cst_99 [0] : vector<8x256xf32> to vector<256xf32>
    %270 = vector.shape_cast %269 : vector<256xf32> to vector<1x256xf32>
    %271 = arith.mulf %266, %266 : vector<8x256xf32>
    %cst_100 = arith.constant dense<0.000000e+00> : vector<256xf32>
    %272 = vector.multi_reduction <add>, %271, %cst_100 [0] : vector<8x256xf32> to vector<256xf32>
    %273 = vector.shape_cast %272 : vector<256xf32> to vector<1x256xf32>
    %274 = tpu.concatenate %270, %273 in 0 : vector<1x256xf32>, vector<1x256xf32> -> vector<2x256xf32>
    %c32_i32_101 = arith.constant 32 : i32
    %275 = tpu.dynamic_rotate %274 by %c32_i32_101 dim 1 : vector<2x256xf32>, i32 -> vector<2x256xf32>
    %276 = arith.addf %274, %275 : vector<2x256xf32>
    %c64_i32_102 = arith.constant 64 : i32
    %277 = tpu.dynamic_rotate %276 by %c64_i32_102 dim 1 : vector<2x256xf32>, i32 -> vector<2x256xf32>
    %278 = arith.addf %276, %277 : vector<2x256xf32>
    %c128_i32_103 = arith.constant 128 : i32
    %279 = tpu.dynamic_rotate %278 by %c128_i32_103 dim 1 : vector<2x256xf32>, i32 -> vector<2x256xf32>
    %280 = arith.addf %278, %279 : vector<2x256xf32>
    %281 = vector.extract_strided_slice %280 {offsets = [0, 0], sizes = [1, 256], strides = [1, 1]} : vector<2x256xf32> to vector<1x256xf32>
    %cst_104 = arith.constant 1.562500e-02 : f32
    %282 = vector.broadcast %cst_104 : f32 to vector<1x256xf32>
    %283 = arith.mulf %281, %282 : vector<1x256xf32>
    %284 = vector.extract_strided_slice %280 {offsets = [1, 0], sizes = [1, 256], strides = [1, 1]} : vector<2x256xf32> to vector<1x256xf32>
    %cst_105 = arith.constant 1.562500e-02 : f32
    %285 = vector.broadcast %cst_105 : f32 to vector<1x256xf32>
    %286 = arith.mulf %284, %285 : vector<1x256xf32>
    %287 = arith.mulf %283, %283 : vector<1x256xf32>
    %288 = arith.subf %286, %287 : vector<1x256xf32>
    %289 = vector.broadcast %283 : vector<1x256xf32> to vector<8x256xf32>
    %290 = arith.subf %266, %289 : vector<8x256xf32>
    %cst_106 = arith.constant 9.99999974E-6 : f32
    %291 = vector.broadcast %cst_106 : f32 to vector<1x256xf32>
    %292 = arith.addf %288, %291 : vector<1x256xf32>
    %293 = math.rsqrt %292 : vector<1x256xf32>
    %294 = vector.broadcast %293 : vector<1x256xf32> to vector<8x256xf32>
    %295 = arith.mulf %290, %294 : vector<8x256xf32>
    %296 = vector.broadcast %267 : vector<1x256xf32> to vector<8x256xf32>
    %297 = arith.mulf %295, %296 : vector<8x256xf32>
    %298 = vector.broadcast %268 : vector<1x256xf32> to vector<8x256xf32>
    %299 = arith.addf %297, %298 : vector<8x256xf32>
    %300 = vector.extract_strided_slice %299 {offsets = [0, 0], sizes = [8, 32], strides = [1, 1]} : vector<8x256xf32> to vector<8x32xf32>
    %301 = vector.extract_strided_slice %299 {offsets = [0, 32], sizes = [8, 32], strides = [1, 1]} : vector<8x256xf32> to vector<8x32xf32>
    %302 = vector.extract_strided_slice %299 {offsets = [0, 64], sizes = [8, 32], strides = [1, 1]} : vector<8x256xf32> to vector<8x32xf32>
    %303 = vector.extract_strided_slice %299 {offsets = [0, 96], sizes = [8, 32], strides = [1, 1]} : vector<8x256xf32> to vector<8x32xf32>
    %304 = vector.extract_strided_slice %299 {offsets = [0, 128], sizes = [8, 32], strides = [1, 1]} : vector<8x256xf32> to vector<8x32xf32>
    %305 = vector.extract_strided_slice %299 {offsets = [0, 160], sizes = [8, 32], strides = [1, 1]} : vector<8x256xf32> to vector<8x32xf32>
    %306 = vector.extract_strided_slice %299 {offsets = [0, 192], sizes = [8, 32], strides = [1, 1]} : vector<8x256xf32> to vector<8x32xf32>
    %307 = vector.extract_strided_slice %299 {offsets = [0, 224], sizes = [8, 32], strides = [1, 1]} : vector<8x256xf32> to vector<8x32xf32>
    %308 = tpu.concatenate %300, %301, %302, %303, %304, %305, %306, %307 in 0 : vector<8x32xf32>, vector<8x32xf32>, vector<8x32xf32>, vector<8x32xf32>, vector<8x32xf32>, vector<8x32xf32>, vector<8x32xf32>, vector<8x32xf32> -> vector<64x32xf32>
    %309 = arith.truncf %308 : vector<64x32xf32> to vector<64x32xbf16>
    %c1_107 = arith.constant 1 : index
    %c0_108 = arith.constant 0 : index
    %c0_109 = arith.constant 0 : index
    %310 = vector.load %arg8[%c1_107, %c0_108, %c0_109] : memref<2x32x64xbf16, #tpu.memory_space<vmem>>, vector<1x32x64xbf16>
    %311 = vector.shape_cast %310 : vector<1x32x64xbf16> to vector<32x64xbf16>
    %cst_110 = arith.constant dense<0.000000e+00> : vector<64x64xf32>
    %312 = tpu.matmul %309, %311, %cst_110 {dimension_numbers = #tpu.dot_dimension_numbers<[1], [0], [0], [1], [0, 0, 1, 1], [], []>} : vector<64x32xbf16>, vector<32x64xbf16>, vector<64x64xf32> -> vector<64x64xf32>
    %c1_111 = arith.constant 1 : index
    %c0_112 = arith.constant 0 : index
    %313 = vector.load %arg9[%c1_111, %c0_112] : memref<2x64xf32, #tpu.memory_space<vmem>>, vector<1x64xf32>
    %314 = vector.broadcast %313 : vector<1x64xf32> to vector<64x64xf32>
    %315 = arith.addf %312, %314 : vector<64x64xf32>
    %cst_113 = arith.constant 5.000000e-01 : f32
    %316 = vector.broadcast %cst_113 : f32 to vector<64x64xf32>
    %317 = arith.mulf %316, %315 : vector<64x64xf32>
    %cst_114 = arith.constant 4.471500e-02 : f32
    %318 = vector.broadcast %cst_114 : f32 to vector<64x64xf32>
    %319 = arith.mulf %318, %315 : vector<64x64xf32>
    %320 = arith.mulf %319, %315 : vector<64x64xf32>
    %321 = arith.mulf %320, %315 : vector<64x64xf32>
    %322 = arith.addf %315, %321 : vector<64x64xf32>
    %cst_115 = arith.constant 0.797884583 : f32
    %323 = vector.broadcast %cst_115 : f32 to vector<64x64xf32>
    %324 = arith.mulf %323, %322 : vector<64x64xf32>
    %325 = math.tanh %324 : vector<64x64xf32>
    %cst_116 = arith.constant 1.000000e+00 : f32
    %326 = vector.broadcast %cst_116 : f32 to vector<64x64xf32>
    %327 = arith.addf %326, %325 : vector<64x64xf32>
    %328 = arith.mulf %317, %327 : vector<64x64xf32>
    %329 = arith.truncf %328 : vector<64x64xf32> to vector<64x64xbf16>
    %c1_117 = arith.constant 1 : index
    %c0_118 = arith.constant 0 : index
    %c0_119 = arith.constant 0 : index
    %330 = vector.load %arg10[%c1_117, %c0_118, %c0_119] : memref<2x64x32xbf16, #tpu.memory_space<vmem>>, vector<1x64x32xbf16>
    %331 = vector.shape_cast %330 : vector<1x64x32xbf16> to vector<64x32xbf16>
    %cst_120 = arith.constant dense<0.000000e+00> : vector<64x32xf32>
    %332 = tpu.matmul %329, %331, %cst_120 {dimension_numbers = #tpu.dot_dimension_numbers<[1], [0], [0], [1], [0, 0, 1, 1], [], []>} : vector<64x64xbf16>, vector<64x32xbf16>, vector<64x32xf32> -> vector<64x32xf32>
    %c1_121 = arith.constant 1 : index
    %c0_122 = arith.constant 0 : index
    %333 = vector.load %arg11[%c1_121, %c0_122] : memref<2x32xf32, #tpu.memory_space<vmem>>, vector<1x32xf32>
    %334 = vector.broadcast %333 : vector<1x32xf32> to vector<64x32xf32>
    %335 = arith.addf %332, %334 : vector<64x32xf32>
    %c1_123 = arith.constant 1 : index
    %c1_124 = arith.constant 1 : index
    %336 = memref.load %arg5[%c1_123, %c1_124] : memref<2x2xf32, #tpu.memory_space<smem>>
    %337 = vector.extract_strided_slice %335 {offsets = [0, 0], sizes = [8, 32], strides = [1, 1]} : vector<64x32xf32> to vector<8x32xf32>
    %338 = vector.extract_strided_slice %335 {offsets = [8, 0], sizes = [8, 32], strides = [1, 1]} : vector<64x32xf32> to vector<8x32xf32>
    %339 = vector.extract_strided_slice %335 {offsets = [16, 0], sizes = [8, 32], strides = [1, 1]} : vector<64x32xf32> to vector<8x32xf32>
    %340 = vector.extract_strided_slice %335 {offsets = [24, 0], sizes = [8, 32], strides = [1, 1]} : vector<64x32xf32> to vector<8x32xf32>
    %341 = vector.extract_strided_slice %335 {offsets = [32, 0], sizes = [8, 32], strides = [1, 1]} : vector<64x32xf32> to vector<8x32xf32>
    %342 = vector.extract_strided_slice %335 {offsets = [40, 0], sizes = [8, 32], strides = [1, 1]} : vector<64x32xf32> to vector<8x32xf32>
    %343 = vector.extract_strided_slice %335 {offsets = [48, 0], sizes = [8, 32], strides = [1, 1]} : vector<64x32xf32> to vector<8x32xf32>
    %344 = vector.extract_strided_slice %335 {offsets = [56, 0], sizes = [8, 32], strides = [1, 1]} : vector<64x32xf32> to vector<8x32xf32>
    %345 = tpu.concatenate %337, %338, %339, %340, %341, %342, %343, %344 in 1 : vector<8x32xf32>, vector<8x32xf32>, vector<8x32xf32>, vector<8x32xf32>, vector<8x32xf32>, vector<8x32xf32>, vector<8x32xf32>, vector<8x32xf32> -> vector<8x256xf32>
    %346 = vector.broadcast %336 : f32 to vector<8x256xf32>
    %347 = arith.mulf %346, %345 : vector<8x256xf32>
    %348 = arith.addf %299, %347 : vector<8x256xf32>
    %c1_125 = arith.constant 1 : index
    %c0_126 = arith.constant 0 : index
    %349 = vector.load %arg12[%c1_125, %c0_126] : memref<2x256xf32, #tpu.memory_space<vmem>>, vector<1x256xf32>
    %c1_127 = arith.constant 1 : index
    %c0_128 = arith.constant 0 : index
    %350 = vector.load %arg13[%c1_127, %c0_128] : memref<2x256xf32, #tpu.memory_space<vmem>>, vector<1x256xf32>
    %cst_129 = arith.constant dense<0.000000e+00> : vector<256xf32>
    %351 = vector.multi_reduction <add>, %348, %cst_129 [0] : vector<8x256xf32> to vector<256xf32>
    %352 = vector.shape_cast %351 : vector<256xf32> to vector<1x256xf32>
    %353 = arith.mulf %348, %348 : vector<8x256xf32>
    %cst_130 = arith.constant dense<0.000000e+00> : vector<256xf32>
    %354 = vector.multi_reduction <add>, %353, %cst_130 [0] : vector<8x256xf32> to vector<256xf32>
    %355 = vector.shape_cast %354 : vector<256xf32> to vector<1x256xf32>
    %356 = tpu.concatenate %352, %355 in 0 : vector<1x256xf32>, vector<1x256xf32> -> vector<2x256xf32>
    %c32_i32_131 = arith.constant 32 : i32
    %357 = tpu.dynamic_rotate %356 by %c32_i32_131 dim 1 : vector<2x256xf32>, i32 -> vector<2x256xf32>
    %358 = arith.addf %356, %357 : vector<2x256xf32>
    %c64_i32_132 = arith.constant 64 : i32
    %359 = tpu.dynamic_rotate %358 by %c64_i32_132 dim 1 : vector<2x256xf32>, i32 -> vector<2x256xf32>
    %360 = arith.addf %358, %359 : vector<2x256xf32>
    %c128_i32_133 = arith.constant 128 : i32
    %361 = tpu.dynamic_rotate %360 by %c128_i32_133 dim 1 : vector<2x256xf32>, i32 -> vector<2x256xf32>
    %362 = arith.addf %360, %361 : vector<2x256xf32>
    %363 = vector.extract_strided_slice %362 {offsets = [0, 0], sizes = [1, 256], strides = [1, 1]} : vector<2x256xf32> to vector<1x256xf32>
    %cst_134 = arith.constant 1.562500e-02 : f32
    %364 = vector.broadcast %cst_134 : f32 to vector<1x256xf32>
    %365 = arith.mulf %363, %364 : vector<1x256xf32>
    %366 = vector.extract_strided_slice %362 {offsets = [1, 0], sizes = [1, 256], strides = [1, 1]} : vector<2x256xf32> to vector<1x256xf32>
    %cst_135 = arith.constant 1.562500e-02 : f32
    %367 = vector.broadcast %cst_135 : f32 to vector<1x256xf32>
    %368 = arith.mulf %366, %367 : vector<1x256xf32>
    %369 = arith.mulf %365, %365 : vector<1x256xf32>
    %370 = arith.subf %368, %369 : vector<1x256xf32>
    %371 = vector.broadcast %365 : vector<1x256xf32> to vector<8x256xf32>
    %372 = arith.subf %348, %371 : vector<8x256xf32>
    %cst_136 = arith.constant 9.99999974E-6 : f32
    %373 = vector.broadcast %cst_136 : f32 to vector<1x256xf32>
    %374 = arith.addf %370, %373 : vector<1x256xf32>
    %375 = math.rsqrt %374 : vector<1x256xf32>
    %376 = vector.broadcast %375 : vector<1x256xf32> to vector<8x256xf32>
    %377 = arith.mulf %372, %376 : vector<8x256xf32>
    %378 = vector.broadcast %349 : vector<1x256xf32> to vector<8x256xf32>
    %379 = arith.mulf %377, %378 : vector<8x256xf32>
    %380 = vector.broadcast %350 : vector<1x256xf32> to vector<8x256xf32>
    %381 = arith.addf %379, %380 : vector<8x256xf32>
    %382 = arith.truncf %381 : vector<8x256xf32> to vector<8x256xbf16>
    %c0_137 = arith.constant 0 : index
    %c0_138 = arith.constant 0 : index
    %383 = vector.load %arg14[%c0_137, %c0_138] : memref<256x8xbf16, #tpu.memory_space<vmem>>, vector<256x8xbf16>
    %cst_139 = arith.constant dense<0.000000e+00> : vector<8x8xf32>
    %384 = tpu.matmul %382, %383, %cst_139 {dimension_numbers = #tpu.dot_dimension_numbers<[1], [0], [0], [1], [0, 0, 1, 1], [], []>} : vector<8x256xbf16>, vector<256x8xbf16>, vector<8x8xf32> -> vector<8x8xf32>
    %c0_140 = arith.constant 0 : index
    %c0_141 = arith.constant 0 : index
    %385 = vector.load %arg15[%c0_140, %c0_141] : memref<1x8xf32, #tpu.memory_space<vmem>>, vector<1x8xf32>
    %386 = vector.broadcast %385 : vector<1x8xf32> to vector<8x8xf32>
    %387 = arith.addf %384, %386 : vector<8x8xf32>
    %c0_142 = arith.constant 0 : index
    %c0_143 = arith.constant 0 : index
    %388 = vector.load %arg16[%c0_142, %c0_143] : memref<8x1xf32, #tpu.memory_space<vmem>>, vector<8x1xf32>
    %389 = vector.broadcast %388 : vector<8x1xf32> to vector<8x8xf32>
    %390 = arith.mulf %387, %389 : vector<8x8xf32>
    %c0_144 = arith.constant 0 : index
    %c0_145 = arith.constant 0 : index
    %391 = vector.load %arg17[%c0_144, %c0_145] : memref<8x1xf32, #tpu.memory_space<vmem>>, vector<8x1xf32>
    %392 = vector.broadcast %391 : vector<8x1xf32> to vector<8x8xf32>
    %393 = arith.addf %390, %392 : vector<8x8xf32>
    %c0_146 = arith.constant 0 : index
    %c0_147 = arith.constant 0 : index
    %394 = vector.load %arg18[%c0_146, %c0_147] : memref<8x8xf32, #tpu.memory_space<vmem>>, vector<8x8xf32>
    tpu.vector_store %arg18[%c0_146, %c0_147], %393 {strides = array<i32>} : memref<8x8xf32, #tpu.memory_space<vmem>>, vector<8x8xf32>,
    return
  }
}

</mosaic_0001>

<bundles_post_ra>
// kernel: forward.1
= control target key start
LH: loop header
LB: loop body
LE: loop exit
PB: predicated region body
PF: predicated region fallthrough
CT: control target
= control target key end

     0   :  { %s2517_s0 = inlined_call_operand.vmem [shape: f32[64,4], index: 0, kind: input, shape index: {}]   ;;  %s2518_s1 = inlined_call_operand.vmem [shape: bf16[4,32], index: 1, kind: input, shape index: {}]   ;;  %s2519_s2 = inlined_call_operand.vmem [shape: f32[1,32], index: 2, kind: input, shape index: {}]   ;;  %s2520_s3 = inlined_call_operand.vmem [shape: f32[26,256], index: 3, kind: input, shape index: {}]   ;;  %s2521_s4 = inlined_call_operand.vmem [shape: f32[2,256], index: 4, kind: input, shape index: {}]   ;;  %s2522_s5 = inlined_call_operand.vmem [shape: f32[2,2], index: 5, kind: input, shape index: {}]   ;;  %s2523_s6 = inlined_call_operand.vmem [shape: f32[2,256], index: 6, kind: input, shape index: {}]   ;;  %s2524_s7 = inlined_call_operand.vmem [shape: f32[2,256], index: 7, kind: input, shape index: {}]   ;;  %s2525_s8 = inlined_call_operand.vmem [shape: bf16[2,32,64], index: 8, kind: input, shape index: {}]   ;;  %s2526_s9 = inlined_call_operand.vmem [shape: f32[2,64], index: 9, kind: input, shape index: {}]   ;;  %s2527_s10 = inlined_call_operand.vmem [shape: bf16[2,64,32], index: 10, kind: input, shape index: {}]   ;;  %s2528_s11 = inlined_call_operand.vmem [shape: f32[2,32], index: 11, kind: input, shape index: {}]   ;;  %s2529_s12 = inlined_call_operand.vmem [shape: f32[2,256], index: 12, kind: input, shape index: {}]   ;;  %s2530_s13 = inlined_call_operand.vmem [shape: f32[2,256], index: 13, kind: input, shape index: {}]   ;;  %s2531_s14 = inlined_call_operand.vmem [shape: bf16[256,8], index: 14, kind: input, shape index: {}]   ;;  %s2532_s15 = inlined_call_operand.vmem [shape: f32[1,8], index: 15, kind: input, shape index: {}]   ;;  %s2533_s16 = inlined_call_operand.vmem [shape: f32[8,1], index: 16, kind: input, shape index: {}]   ;;  %s2534_s17 = inlined_call_operand.vmem [shape: f32[8,1], index: 17, kind: input, shape index: {}]   ;;  %s2535_s18 = inlined_call_operand.hbm [shape: f32[8,8], index: 18, kind: output, shape index: {}]  }
   0x1   :  { %2537 = sst [smem:[#allocation8_spill]] %s2517_s0 }
   0x2   :  { %2538 = sst [smem:[#allocation9_spill]] %s2518_s1 }
   0x3   :  { %2539 = sst [smem:[#allocation10_spill]] %s2519_s2 }
   0x4   :  { %23 = vsyncpa [#allocation4], 0 }
   0x5   :  { %24 = vsyncpa [#allocation3], 0  ;;  %s40_s29 = sshll.u32 %s2522_s5, 4  ;;  %s1870_s30 = smov [#allocation2]   ;;  %s41_s29 = int_to_ptr.vmem [resolvable:$true] %s40_s29 }
   0x6   :  { %43 = dma.vmem_to_smem %s41_s29, 32, %s1870_s30, [#allocation4]  }
   0x7   :  { %1866 = dma.done.wait [#allocation4], 32  }
   0x8   :  { %1867 = vsyncadd [#allocation4], 4294967264 }
   0x9   :  { %72 = sfence }
   0xa   :  { %s2540_s1 = sld [smem:[#allocation9_spill]]  ;;  %vm104_vm0 = vcmask 1041408   ;;  %vm91_vm1 = vcmask 31744   ;;  %s1871_s5 = smov 32   ;;  %vm161_vm2 = vcmask 261120   ;;  %vm163_vm3 = vcmask 523264  }
   0xb   :  { %s2541_s22 = sld [smem:[#allocation8_spill]]  ;;  %s1873_s24 = smov 96   ;;  %vm165_vm4 = vcmask 785408   ;;  %v183_v43 = vlaneseq  ;;  %v188_v46 = vld [vmem:[%s2520_s3] ss:$8 sm:$0x3] }
   0xc   :  { %s2542_s23 = sld [smem:[#allocation10_spill]]  ;;  %v1571_v47 = vld [vmem:[%s2520_s3 + $0x3] ss:$8 sm:$0x3]  ;;  %v190_v49 = vperm.slane %v188_v46, 0  ;;  %v191_v50 = vperm.slane %v188_v46, 1 }
   0xd   :  { %v2032_v45 = vand.u32 127, %v183_v43  ;;  %v173_v51 = vperm.slane %v1571_v47, 0  ;;  %v174_v52 = vperm.slane %v1571_v47, 1  ;;  %v1572_v56 = vld [vmem:[%s2520_s3 + $0x1] ss:$8 sm:$0x3] }
   0xe   :  { %v1573_v60 = vld [vmem:[%s2520_s3 + $0x2] ss:$8 sm:$0x3]  ;;  %v208_v63 = vperm.slane %v1572_v56, 0  ;;  %s275_s28 = sld [smem:[#allocation2]]  ;;  %vm327_vm8 = vcmask 1040384  }
   0xf   :  { %vm185_vm5 = vcmp.lt.s32.totalorder %v2032_v45, 96  ;;  %vm202_vm6 = vcmp.lt.s32.totalorder %v2032_v45, 64  ;;  %vm220_vm7 = vcmp.lt.s32.totalorder %v2032_v45, 32  ;;  %s2177_s2 = sld [smem:[#allocation2 + $0x1]]  ;;  %v1758_v45 = vld [vmem:[%s2531_s14 + $0x40] sm:$0xff]  ;;  %s1557_s27 = sshll.u32 %s2535_s18, 4  ;;  %s1558_s27 = int_to_ptr.hbm [resolvable:$true] %s1557_s27 }
  0x10   :  { %v86_v0 = vld [vmem:[%s2540_s1] sm:$0x3] }
  0x11   :  { %v74_v1 = vld [vmem:[%s2541_s22] sm:$0xff]  ;;  %v75_v2 = vld [vmem:[%s2541_s22 + $0x8] sm:$0xff]  ;;  %v106_v3 = vsel %vm104_vm0, %v86_v0, 0  ;;  %v76_v8 = vld [vmem:[%s2541_s22 + $0x10] sm:$0xff]  ;;  %v209_v0 = vperm.slane %v1572_v56, 1 }
  0x12   :  { %v82_v4 = vpack.c.bf16 %v75_v2, %v74_v1  ;;  %v78_v5 = vld [vmem:[%s2541_s22 + $0x20] sm:$0xff]  ;;  %v79_v6 = vld [vmem:[%s2541_s22 + $0x28] sm:$0xff]  ;;  %115 = vmatpush.bf16.msra.mxu0 %v106_v3  ;;  %1766 = vmatpush.bf16.msra.mxu2 %v106_v3  ;;  %v77_v9 = vld [vmem:[%s2541_s22 + $0x18] sm:$0xff] }
  0x13   :  { %v84_v7 = vpack.c.bf16 %v79_v6, %v78_v5  ;;  %v80_v10 = vld [vmem:[%s2541_s22 + $0x30] sm:$0xff]  ;;  %v81_v11 = vld [vmem:[%s2541_s22 + $0x38] sm:$0xff]  ;;  %v83_v12 = vpack.c.bf16 %v77_v9, %v76_v8  ;;  %v1776_v14 = vld [vmem:[%s2542_s23] ss:$0 sm:$0xff]  ;;  %s1872_s22 = smov 64   ;;  %v227_v8 = vperm.slane %v1573_v60, 1 }
  0x14   :  { %v85_v13 = vpack.c.bf16 %v81_v11, %v80_v10  ;;  %v1574_v1 = vld [vmem:[%s2520_s3 + $0x4] ss:$8 sm:$0x3]  ;;  %v1575_v6 = vld [vmem:[%s2520_s3 + $0x5] ss:$8 sm:$0x3] }
  0x15   :  { %1567 = vmatmul.msk.bf16.vlgmr.msra.gmra.mxu0 %vm91_vm1, %v82_v4  ;;  %1569 = vmatmul.msk.bf16.vlgmr.msra.gmra.mxu2 %vm91_vm1, %v84_v7  ;;  %v226_v7 = vperm.slane %v1573_v60, 0  ;;  %v237_v10 = vperm.slane %v1574_v1, 0  ;;  %v238_v11 = vperm.slane %v1574_v1, 1 }
  0x25   :  { %1568 = vmatmul.msk.bf16.gmra.mxu0 %vm91_vm1, %v83_v12  ;;  %1570 = vmatmul.msk.bf16.gmra.mxu2 %vm91_vm1, %v85_v13 }
  0x92   :  { %v117_v15 = vpop.f32.mrf.mxu0 }
  0x93   :  { %v118_v16 = vadd.f32 %v1776_v14, %v117_v15 }
  0x98   :  { %v127_v17 = vpop.f32.mrf.mxu2 }
  0x99   :  { %v128_v18 = vadd.f32 %v1776_v14, %v127_v17  ;;  %v249_v17 = vperm.slane %v1575_v6, 1 }
  0x9a   :  { %v119_v19 = vpop.f32.mrf.mxu0 }
  0x9b   :  { %v120_v20 = vadd.f32 %v1776_v14, %v119_v19 }
  0x9d   :  { %138 = vrot.lane.b32.xlu0 %v120_v20, %s1871_s5 }
  0xa0   :  { %v129_v21 = vpop.f32.mrf.mxu2 }
  0xa1   :  { %v130_v23 = vadd.f32 %v1776_v14, %v129_v21 }
  0xa2   :  { %v122_v22 = vpop.f32.mrf.mxu0 }
  0xa3   :  { %v123_v24 = vadd.f32 %v1776_v14, %v122_v22 }
  0xa5   :  { %142 = vrot.lane.b32.xlu1 %v123_v24, %s1872_s22  ;;  %150 = vrot.lane.b32.xlu0 %v130_v23, %s1871_s5 }
  0xa8   :  { %v132_v25 = vpop.f32.mrf.mxu2 }
  0xa9   :  { %v133_v26 = vadd.f32 %v1776_v14, %v132_v25 }
  0xaa   :  { %v124_v27 = vpop.f32.mrf.mxu0 }
  0xab   :  { %v125_v28 = vadd.f32 %v1776_v14, %v124_v27 }
  0xad   :  { %146 = vrot.lane.b32.xlu2 %v125_v28, %s1873_s24  ;;  %154 = vrot.lane.b32.xlu1 %v133_v26, %s1872_s22  ;;  %v267_v28 = vld [vmem:[%s2521_s4] ss:$2 sm:$0x3] }
  0xb0   :  { %v134_v29 = vpop.f32.mrf.mxu2 }
  0xb1   :  { %v135_v30 = vadd.f32 %v1776_v14, %v134_v29  ;;  %v1576_v14 = vld [vmem:[%s2520_s3 + $0x6] ss:$8 sm:$0x3] }
  0xb2   :  { %v259_v24 = vperm.slane %v1576_v14, 0  ;;  %v260_v25 = vperm.slane %v1576_v14, 1 }
  0xb5   :  { %158 = vrot.lane.b32.xlu2 %v135_v30, %s1873_s24 }
 0x107   :  { %v147_v32 = vpop.permute.xlu2 %146 }
 0x10f   :  { %v139_v31 = vpop.permute.xlu0 %138  ;;  %v159_v40 = vpop.permute.xlu2 %158 }
 0x110   :  { %v162_v33 = vsel %vm161_vm2, %v118_v16, %v139_v31  ;;  %v248_v16 = vperm.slane %v1575_v6, 0 }
 0x117   :  { %v143_v34 = vpop.permute.xlu1 %142  ;;  %v151_v37 = vpop.permute.xlu0 %150 }
 0x118   :  { %v164_v35 = vsel %vm163_vm3, %v162_v33, %v143_v34  ;;  %v167_v38 = vsel %vm161_vm2, %v128_v18, %v151_v37  ;;  %v270_v37 = vperm.slane %v267_v28, 1 }
 0x119   :  { %v2013_v36 = vsel %vm165_vm4, %v164_v35, %v147_v32  ;;  %v269_v35 = vperm.slane %v267_v28, 0 }
 0x11a   :  { %198 = vrot.lane.b32.xlu2 %v2013_v36, %s1872_s22  ;;  %179 = vrot.lane.b32.xlu0 %v2013_v36, %s1873_s24  ;;  %v177_v61 = vmul.f32 %v173_v51, %v2013_v36 }
 0x11f   :  { %v155_v39 = vpop.permute.xlu1 %154 }
 0x120   :  { %v168_v41 = vsel %vm163_vm3, %v167_v38, %v155_v39 }
 0x121   :  { %v2022_v42 = vsel %vm165_vm4, %v168_v41, %v159_v40 }
 0x122   :  { %181 = vrot.lane.b32.xlu1 %v2022_v42, %s1873_s24  ;;  %218 = vrot.lane.b32.xlu2 %v2022_v42, %s1871_s5  ;;  %v178_v62 = vmul.f32 %v174_v52, %v2022_v42 }
 0x123   :  { %200 = vrot.lane.b32.xlu0 %v2022_v42, %s1872_s22 }
 0x12a   :  { %216 = vrot.lane.b32.xlu1 %v2013_v36, %s1871_s5 }
 0x174   :  { %v199_v48 = vpop.permute.xlu2 %198 }
 0x17c   :  { %v219_v9 = vpop.permute.xlu2 %218 }
 0x18c   :  { %v180_v44 = vpop.permute.xlu0 %179 }
 0x194   :  { %v182_v53 = vpop.permute.xlu1 %181 }
 0x195   :  { %v186_v54 = vsel %vm185_vm5, %v180_v44, %v182_v53  ;;  %v187_v55 = vsel %vm185_vm5, %v182_v53, %v180_v44  ;;  %v201_v59 = vpop.permute.xlu0 %200 }
 0x196   :  { %v194_v57 = vmul.f32 %v190_v49, %v187_v55  ;;  %v195_v58 = vmul.f32 %v191_v50, %v186_v54  ;;  %v203_v2 = vsel %vm202_vm6, %v199_v48, %v201_v59  ;;  %v204_v3 = vsel %vm202_vm6, %v201_v59, %v199_v48 }
 0x197   :  { %v212_v12 = vmul.f32 %v208_v63, %v204_v3  ;;  %v213_v13 = vmul.f32 %v209_v0, %v203_v2  ;;  %v241_v26 = vmul.f32 %v237_v10, %v186_v54  ;;  %v242_v27 = vmul.f32 %v238_v11, %v187_v55 }
 0x198   :  { %v196_v4 = vadd.f32 %v194_v57, %v177_v61  ;;  %v197_v5 = vadd.f32 %v195_v58, %v178_v62  ;;  %v252_v31 = vmul.f32 %v248_v16, %v203_v2  ;;  %v253_v32 = vmul.f32 %v249_v17, %v204_v3 }
 0x199   :  { %v294_v0 = vstv %s275_s28 }
 0x19a   :  { %v214_v20 = vadd.f32 %v212_v12, %v196_v4  ;;  %v215_v21 = vadd.f32 %v213_v13, %v197_v5 }
 0x19c   :  { %v217_v15 = vpop.permute.xlu1 %216 }
 0x19d   :  { %v221_v18 = vsel %vm220_vm7, %v217_v15, %v219_v9  ;;  %v222_v19 = vsel %vm220_vm7, %v219_v9, %v217_v15 }
 0x19e   :  { %v230_v22 = vmul.f32 %v226_v7, %v222_v19  ;;  %v231_v23 = vmul.f32 %v227_v8, %v221_v18  ;;  %v263_v40 = vmul.f32 %v259_v24, %v221_v18  ;;  %v264_v41 = vmul.f32 %v260_v25, %v222_v19 }
 0x1a0   :  { %v232_v29 = vadd.f32 %v230_v22, %v214_v20  ;;  %v233_v30 = vadd.f32 %v231_v23, %v215_v21 }
 0x1a2   :  { %v243_v33 = vadd.f32 %v241_v26, %v232_v29  ;;  %v244_v34 = vadd.f32 %v242_v27, %v233_v30 }
 0x1a4   :  { %v254_v38 = vadd.f32 %v252_v31, %v243_v33  ;;  %v255_v39 = vadd.f32 %v253_v32, %v244_v34 }
 0x1a6   :  { %v265_v43 = vadd.f32 %v263_v40, %v254_v38  ;;  %v266_v44 = vadd.f32 %v264_v41, %v255_v39 }
 0x1a8   :  { %v273_v46 = vadd.f32 %v269_v35, %v265_v43  ;;  %v274_v47 = vadd.f32 %v270_v37, %v266_v44 }
 0x1aa   :  { %v278_v48 = vmul.f32 0.044715, %v273_v46  ;;  %v279_v49 = vmul.f32 0.044715, %v274_v47  ;;  %v276_v60 = vmul.f32 0.5, %v273_v46  ;;  %v277_v62 = vmul.f32 0.5, %v274_v47 }
 0x1ac   :  { %v280_v50 = vmul.f32 %v278_v48, %v273_v46  ;;  %v281_v51 = vmul.f32 %v279_v49, %v274_v47 }
 0x1ae   :  { %v282_v52 = vmul.f32 %v280_v50, %v273_v46  ;;  %v283_v53 = vmul.f32 %v281_v51, %v274_v47 }
 0x1b0   :  { %v284_v54 = vadd.f32 %v282_v52, %v273_v46  ;;  %v285_v55 = vadd.f32 %v283_v53, %v274_v47 }
 0x1b2   :  { %v286_v56 = vmul.f32 0.7978846, %v284_v54  ;;  %v287_v57 = vmul.f32 0.7978846, %v285_v55 }
 0x1b4   :  { %1782 = vtanh.f32 %v286_v56 }
 0x1b5   :  { %1784 = vtanh.f32 %v287_v57 }
 0x1ba   :  { %v1783_v58 = vpop.eup %1782 }
 0x1bb   :  { %v1785_v59 = vpop.eup %1784  ;;  %v290_v61 = vadd.f32 1.0, %v1783_v58 }
 0x1bc   :  { %v291_v63 = vadd.f32 1.0, %v1785_v59 }
 0x1bd   :  { %v292_v1 = vmul.f32 %v290_v61, %v276_v60  ;;  %v299_v61 = vld [vmem:[%s2523_s6] ss:$2 sm:$0x3] }
 0x1be   :  { %v293_v2 = vmul.f32 %v291_v63, %v277_v62  ;;  %v300_v63 = vld [vmem:[%s2524_s7] ss:$2 sm:$0x3] }
 0x1bf   :  { %v295_v3 = vmul.f32 %v294_v0, %v292_v1 }
 0x1c0   :  { %v296_v4 = vmul.f32 %v294_v0, %v293_v2  ;;  %v371_v2 = vperm.slane %v299_v61, 0 }
 0x1c1   :  { %v2076_v5 = vadd.f32 %v295_v3, %v2013_v36 }
 0x1c2   :  { %v2079_v6 = vadd.f32 %v296_v4, %v2022_v42  ;;  %v378_v4 = vperm.slane %v300_v63, 0 }
 0x1c3   :  { %v301_v7 = vrot.slane %v2076_v5, 4  ;;  %v313_v8 = vmul.f32 %v2076_v5, %v2076_v5 }
 0x1c4   :  { %v307_v9 = vrot.slane %v2079_v6, 4  ;;  %v314_v10 = vmul.f32 %v2079_v6, %v2079_v6 }
 0x1c5   :  { %v302_v11 = vadd.f32 %v301_v7, %v2076_v5  ;;  %v315_v12 = vrot.slane %v313_v8, 4 }
 0x1c6   :  { %v308_v13 = vadd.f32 %v307_v9, %v2079_v6  ;;  %v321_v36 = vrot.slane %v314_v10, 4 }
 0x1c7   :  { %v303_v14 = vrot.slane %v302_v11, 2  ;;  %v316_v15 = vadd.f32 %v315_v12, %v313_v8  ;;  %v379_v12 = vperm.slane %v300_v63, 1 }
 0x1c8   :  { %v309_v42 = vrot.slane %v308_v13, 2  ;;  %v322_v16 = vadd.f32 %v321_v36, %v314_v10  ;;  %v1738_v36 = vld [vmem:[%s2525_s8] sm:$0xff] }
 0x1c9   :  { %v304_v17 = vadd.f32 %v303_v14, %v302_v11  ;;  %v317_v18 = vrot.slane %v316_v15, 2  ;;  %v372_v11 = vperm.slane %v299_v61, 1 }
 0x1ca   :  { %v310_v19 = vadd.f32 %v309_v42, %v308_v13  ;;  %v323_v20 = vrot.slane %v322_v16, 2 }
 0x1cb   :  { %v305_v21 = vrot.slane %v304_v17, 1  ;;  %v318_v22 = vadd.f32 %v317_v18, %v316_v15 }
 0x1cc   :  { %v311_v23 = vrot.slane %v310_v19, 1  ;;  %v324_v24 = vadd.f32 %v323_v20, %v322_v16 }
 0x1cd   :  { %v319_v25 = vrot.slane %v318_v22, 1  ;;  %v306_v27 = vadd.f32 %v305_v21, %v304_v17 }
 0x1ce   :  { %v325_v26 = vrot.slane %v324_v24, 1  ;;  %v312_v29 = vadd.f32 %v311_v23, %v310_v19  ;;  %v1743_v23 = vld [vmem:[%s2527_s10 + $0x18] sm:$0xff] }
 0x1cf   :  { %v320_v28 = vadd.f32 %v319_v25, %v318_v22  ;;  %593 = vmatpush.bf16.msrb.mxu2 %v1743_v23  ;;  %v1741_v25 = vld [vmem:[%s2527_s10 + $0x8] sm:$0xff] }
 0x1d0   :  { %v326_v30 = vadd.f32 %v325_v26, %v324_v24  ;;  %v1742_v24 = vld [vmem:[%s2527_s10 + $0x10] sm:$0xff]  ;;  %v2151_v26 = vld [vmem:[%s2526_s9] ss:$0 sm:$0xff] }
 0x1d1   :  { %v328_v31 = vsel %vm327_vm8, %v306_v27, %v320_v28  ;;  %v1740_v27 = vld [vmem:[%s2527_s10] sm:$0xff] }
 0x1d2   :  { %v329_v32 = vsel %vm327_vm8, %v312_v29, %v326_v30  ;;  %330 = vrot.lane.b32.xlu0 %v328_v31, %s1871_s5 }
 0x1d3   :  { %332 = vrot.lane.b32.xlu1 %v329_v32, %s1871_s5  ;;  %594 = vmatpush.bf16.msrb.mxu2 %v1742_v24 }
 0x1d7   :  { %595 = vmatpush.bf16.msrb.mxu2 %v1741_v25 }
 0x1db   :  { %596 = vmatpush.bf16.msrb.mxu2 %v1740_v27 }
 0x244   :  { %v331_v33 = vpop.permute.xlu0 %330 }
 0x245   :  { %v333_v34 = vpop.permute.xlu1 %332 }
 0x246   :  { %v334_v35 = vsel %vm220_vm7, %v331_v33, %v333_v34  ;;  %v335_v37 = vsel %vm220_vm7, %v333_v34, %v331_v33 }
 0x247   :  { %v336_v38 = vadd.f32 %v335_v37, %v328_v31  ;;  %v337_v39 = vadd.f32 %v334_v35, %v329_v32 }
 0x249   :  { %338 = vrot.lane.b32.xlu2 %v336_v38, %s1872_s22  ;;  %340 = vrot.lane.b32.xlu0 %v337_v39, %s1872_s22 }
 0x2a3   :  { %v339_v40 = vpop.permute.xlu2 %338 }
 0x2bb   :  { %v341_v41 = vpop.permute.xlu0 %340 }
 0x2bc   :  { %v342_v43 = vsel %vm202_vm6, %v339_v40, %v341_v41  ;;  %v343_v44 = vsel %vm202_vm6, %v341_v41, %v339_v40 }
 0x2bd   :  { %v344_v46 = vadd.f32 %v343_v44, %v336_v38  ;;  %v345_v47 = vadd.f32 %v342_v43, %v337_v39 }
 0x2bf   :  { %v346_v48 = vadd.f32 %v345_v47, %v344_v46 }
 0x2c1   :  { %v347_v49 = vmul.f32 0.015625, %v346_v48 }
 0x2c3   :  { %v348_v50 = vmul.f32 %v347_v49, %v347_v49  ;;  %v353_v59 = vperm.slane %v347_v49, 0 }
 0x2c5   :  { %v350_v51 = vrot.slane %v348_v50, 7  ;;  %v354_v0 = vsub.f32 %v2076_v5, %v353_v59  ;;  %v355_v7 = vsub.f32 %v2079_v6, %v353_v59  ;;  %v1739_v6 = vld [vmem:[%s2525_s8 + $0x8] sm:$0xff] }
 0x2c6   :  { %444 = vmatpush.bf16.msra.mxu1 %v1739_v6 }
 0x2c7   :  { %v352_v52 = vsub.f32 %v347_v49, %v350_v51 }
 0x2c9   :  { %v356_v53 = vadd.f32 1e-05, %v352_v52 }
 0x2ca   :  { %445 = vmatpush.bf16.msra.mxu1 %v1738_v36 }
 0x2cb   :  { %1786 = vrsqrt.f32 %v356_v53  ;;  %vm363_vm10 = vweird.f32 %v356_v53 }
 0x2d1   :  { %v1787_v54 = vpop.eup %1786 }
 0x2d2   :  { %v358_v55 = vmul.f32 %v1787_v54, %v356_v53  ;;  %vm364_vm9 = vweird.f32 %v1787_v54 }
 0x2d3   :  { %vm365_vm11 = vmor %vm363_vm10, %vm364_vm9 }
 0x2d4   :  { %v359_v56 = vmul.f32 %v1787_v54, %v358_v55 }
 0x2d6   :  { %v360_v57 = vmul.f32 0.5, %v359_v56 }
 0x2d8   :  { %v361_v58 = vsub.f32 1.5, %v360_v57 }
 0x2da   :  { %v362_v60 = vmul.f32 %v1787_v54, %v361_v58 }
 0x2dc   :  { %v366_v62 = vsel %vm365_vm11, %v1787_v54, %v362_v60 }
 0x2dd   :  { %v367_v1 = vperm.slane %v366_v62, 1 }
 0x2df   :  { %v368_v3 = vmul.f32 %v367_v1, %v354_v0  ;;  %v369_v9 = vmul.f32 %v367_v1, %v355_v7 }
 0x2e1   :  { %v375_v8 = vmul.f32 %v371_v2, %v368_v3  ;;  %v376_v5 = vmul.f32 %v372_v11, %v369_v9 }
 0x2e3   :  { %v2111_v10 = vadd.f32 %v378_v4, %v375_v8  ;;  %v2119_v13 = vadd.f32 %v379_v12, %v376_v5 }
 0x2e5   :  { %391 = vrot.lane.b32.xlu0 %v2111_v10, %s1871_s5  ;;  %388 = vrot.lane.b32.xlu2 %v2111_v10, %s1872_s22 }
 0x2e6   :  { %385 = vrot.lane.b32.xlu1 %v2111_v10, %s1873_s24 }
 0x2ed   :  { %401 = vrot.lane.b32.xlu0 %v2119_v13, %s1871_s5  ;;  %398 = vrot.lane.b32.xlu2 %v2119_v13, %s1872_s22 }
 0x2ee   :  { %395 = vrot.lane.b32.xlu1 %v2119_v13, %s1873_s24 }
 0x33f   :  { %v389_v16 = vpop.permute.xlu2 %388 }
 0x347   :  { %v399_v21 = vpop.permute.xlu2 %398 }
 0x357   :  { %v392_v42 = vpop.permute.xlu0 %391 }
 0x358   :  { %v386_v14 = vpop.permute.xlu1 %385  ;;  %v405_v17 = vpack.c.bf16 %v392_v42, %v389_v16 }
 0x359   :  { %v404_v15 = vpack.c.bf16 %v386_v14, %v2111_v10 }
 0x35b   :  { %1585 = vmatmul.msk.bf16.vlgmr.msra.gmra.mxu1 %vm161_vm2, %v404_v15 }
 0x35f   :  { %v402_v20 = vpop.permute.xlu0 %401 }
 0x360   :  { %v396_v18 = vpop.permute.xlu1 %395  ;;  %v407_v22 = vpack.c.bf16 %v402_v20, %v399_v21 }
 0x361   :  { %v406_v19 = vpack.c.bf16 %v396_v18, %v2119_v13 }
 0x36b   :  { %1586 = vmatmul.msk.bf16.gmra.mxu1 %vm161_vm2, %v405_v17 }
 0x37b   :  { %1587 = vmatmul.msk.bf16.gmra.mxu1 %vm161_vm2, %v406_v19 }
 0x38b   :  { %1588 = vmatmul.msk.bf16.gmra.mxu1 %vm161_vm2, %v407_v22 }
 0x3d8   :  { %v447_v28 = vpop.f32.mrf.mxu1 }
 0x3d9   :  { %v448_v29 = vadd.f32 %v2151_v26, %v447_v28 }
 0x3db   :  { %v475_v30 = vmul.f32 0.044715, %v448_v29  ;;  %v467_v57 = vmul.f32 0.5, %v448_v29 }
 0x3dd   :  { %v483_v31 = vmul.f32 %v475_v30, %v448_v29 }
 0x3df   :  { %v491_v32 = vmul.f32 %v483_v31, %v448_v29 }
 0x3e0   :  { %v449_v33 = vpop.f32.mrf.mxu1 }
 0x3e1   :  { %v499_v34 = vadd.f32 %v491_v32, %v448_v29  ;;  %v450_v35 = vadd.f32 %v2151_v26, %v449_v33 }
 0x3e3   :  { %v476_v37 = vmul.f32 0.044715, %v450_v35  ;;  %v507_v38 = vmul.f32 0.7978846, %v499_v34  ;;  %v468_v58 = vmul.f32 0.5, %v450_v35 }
 0x3e5   :  { %v484_v39 = vmul.f32 %v476_v37, %v450_v35  ;;  %1788 = vtanh.f32 %v507_v38 }
 0x3e7   :  { %v492_v40 = vmul.f32 %v484_v39, %v450_v35 }
 0x3e8   :  { %v452_v41 = vpop.f32.mrf.mxu1 }
 0x3e9   :  { %v500_v43 = vadd.f32 %v492_v40, %v450_v35  ;;  %v453_v44 = vadd.f32 %v2151_v26, %v452_v41 }
 0x3eb   :  { %v508_v46 = vmul.f32 0.7978846, %v500_v43  ;;  %v477_v47 = vmul.f32 0.044715, %v453_v44  ;;  %v1789_v49 = vpop.eup %1788  ;;  %v469_v16 = vmul.f32 0.5, %v453_v44 }
 0x3ec   :  { %v523_v54 = vadd.f32 1.0, %v1789_v49 }
 0x3ed   :  { %v485_v48 = vmul.f32 %v477_v47, %v453_v44  ;;  %1790 = vtanh.f32 %v508_v46 }
 0x3ee   :  { %v531_v62 = vmul.f32 %v523_v54, %v467_v57 }
 0x3ef   :  { %v493_v50 = vmul.f32 %v485_v48, %v453_v44 }
 0x3f0   :  { %v454_v51 = vpop.f32.mrf.mxu1 }
 0x3f1   :  { %v455_v52 = vadd.f32 %v2151_v26, %v454_v51  ;;  %v501_v53 = vadd.f32 %v493_v50, %v453_v44 }
 0x3f3   :  { %v1791_v55 = vpop.eup %1790  ;;  %v478_v56 = vmul.f32 0.044715, %v455_v52  ;;  %v509_v61 = vmul.f32 0.7978846, %v501_v53  ;;  %v470_v17 = vmul.f32 0.5, %v455_v52 }
 0x3f4   :  { %v524_v59 = vadd.f32 1.0, %v1791_v55 }
 0x3f5   :  { %v486_v60 = vmul.f32 %v478_v56, %v455_v52  ;;  %1792 = vtanh.f32 %v509_v61 }
 0x3f6   :  { %v532_v63 = vmul.f32 %v524_v59, %v468_v58 }
 0x3f7   :  { %v494_v0 = vmul.f32 %v486_v60, %v455_v52 }
 0x3f8   :  { %v457_v1 = vpop.f32.mrf.mxu1  ;;  %v539_v2 = vpack.c.bf16 %v532_v63, %v531_v62  ;;  %v1778_v62 = vld [vmem:[%s2528_s11] ss:$0 sm:$0xff] }
 0x3f9   :  { %v458_v3 = vadd.f32 %v2151_v26, %v457_v1  ;;  %v502_v4 = vadd.f32 %v494_v0, %v455_v52 }
 0x3fa   :  { %1605 = vmatmul.msk.bf16.vlgmr.msrb.gmra.mxu2 %vm163_vm3, %v539_v2 }
 0x3fb   :  { %v479_v7 = vmul.f32 0.044715, %v458_v3  ;;  %v510_v8 = vmul.f32 0.7978846, %v502_v4  ;;  %v1793_v11 = vpop.eup %1792  ;;  %v471_v41 = vmul.f32 0.5, %v458_v3 }
 0x3fc   :  { %v525_v14 = vadd.f32 1.0, %v1793_v11 }
 0x3fd   :  { %v487_v9 = vmul.f32 %v479_v7, %v458_v3  ;;  %1794 = vtanh.f32 %v510_v8 }
 0x3fe   :  { %v533_v21 = vmul.f32 %v525_v14, %v469_v16 }
 0x3ff   :  { %v495_v5 = vmul.f32 %v487_v9, %v458_v3 }
 0x400   :  { %v459_v12 = vpop.f32.mrf.mxu1 }
 0x401   :  { %v460_v6 = vadd.f32 %v2151_v26, %v459_v12  ;;  %v503_v36 = vadd.f32 %v495_v5, %v458_v3 }
 0x403   :  { %v1795_v15 = vpop.eup %1794  ;;  %v480_v42 = vmul.f32 0.044715, %v460_v6  ;;  %v511_v20 = vmul.f32 0.7978846, %v503_v36  ;;  %v472_v43 = vmul.f32 0.5, %v460_v6 }
 0x404   :  { %v526_v18 = vadd.f32 1.0, %v1795_v15 }
 0x405   :  { %v488_v19 = vmul.f32 %v480_v42, %v460_v6  ;;  %1796 = vtanh.f32 %v511_v20 }
 0x406   :  { %v534_v22 = vmul.f32 %v526_v18, %v470_v17 }
 0x407   :  { %v496_v23 = vmul.f32 %v488_v19, %v460_v6  ;;  %v649_v19 = vstv %s2177_s2  ;;  %s1875_s2 = smov [#allocation5]  }
 0x408   :  { %v462_v24 = vpop.f32.mrf.mxu1  ;;  %v540_v25 = vpack.c.bf16 %v534_v22, %v533_v21  ;;  %s1555_s23 = sshll.u32 %s1875_s2, 4  ;;  %s1556_s23 = int_to_ptr.vmem [resolvable:$true] %s1555_s23 }
 0x409   :  { %v463_v27 = vadd.f32 %v2151_v26, %v462_v24  ;;  %v504_v28 = vadd.f32 %v496_v23, %v460_v6 }
 0x40a   :  { %1606 = vmatmul.msk.bf16.gmra.mxu2 %vm163_vm3, %v540_v25 }
 0x40b   :  { %v481_v29 = vmul.f32 0.044715, %v463_v27  ;;  %v512_v30 = vmul.f32 0.7978846, %v504_v28  ;;  %v1797_v32 = vpop.eup %1796  ;;  %v473_v56 = vmul.f32 0.5, %v463_v27 }
 0x40c   :  { %v527_v38 = vadd.f32 1.0, %v1797_v32 }
 0x40d   :  { %v489_v31 = vmul.f32 %v481_v29, %v463_v27  ;;  %1798 = vtanh.f32 %v512_v30 }
 0x40e   :  { %v535_v48 = vmul.f32 %v527_v38, %v471_v41 }
 0x40f   :  { %v497_v33 = vmul.f32 %v489_v31, %v463_v27 }
 0x410   :  { %v464_v34 = vpop.f32.mrf.mxu1 }
 0x411   :  { %v465_v35 = vadd.f32 %v2151_v26, %v464_v34  ;;  %v505_v37 = vadd.f32 %v497_v33, %v463_v27 }
 0x413   :  { %v1799_v39 = vpop.eup %1798  ;;  %v482_v40 = vmul.f32 0.044715, %v465_v35  ;;  %v513_v47 = vmul.f32 0.7978846, %v505_v37  ;;  %v474_v57 = vmul.f32 0.5, %v465_v35 }
 0x414   :  { %v528_v44 = vadd.f32 1.0, %v1799_v39 }
 0x415   :  { %v490_v46 = vmul.f32 %v482_v40, %v465_v35  ;;  %1800 = vtanh.f32 %v513_v47 }
 0x416   :  { %v536_v49 = vmul.f32 %v528_v44, %v472_v43 }
 0x417   :  { %v498_v50 = vmul.f32 %v490_v46, %v465_v35 }
 0x418   :  { %v541_v51 = vpack.c.bf16 %v536_v49, %v535_v48 }
 0x419   :  { %v506_v52 = vadd.f32 %v498_v50, %v465_v35 }
 0x41a   :  { %1607 = vmatmul.msk.bf16.gmra.mxu2 %vm163_vm3, %v541_v51 }
 0x41b   :  { %v514_v53 = vmul.f32 0.7978846, %v506_v52  ;;  %v1801_v26 = vpop.eup %1800 }
 0x41c   :  { %v529_v54 = vadd.f32 1.0, %v1801_v26 }
 0x41d   :  { %1802 = vtanh.f32 %v514_v53 }
 0x41e   :  { %v537_v59 = vmul.f32 %v529_v54, %v473_v56 }
 0x423   :  { %v1803_v55 = vpop.eup %1802 }
 0x424   :  { %v530_v58 = vadd.f32 1.0, %v1803_v55 }
 0x426   :  { %v538_v60 = vmul.f32 %v530_v58, %v474_v57 }
 0x428   :  { %v542_v61 = vpack.c.bf16 %v538_v60, %v537_v59 }
 0x42a   :  { %1608 = vmatmul.msk.bf16.gmra.mxu2 %vm163_vm3, %v542_v61 }
 0x47d   :  { %v598_v63 = vpop.f32.mrf.mxu2 }
 0x47e   :  { %v599_v0 = vadd.f32 %v1778_v62, %v598_v63 }
 0x485   :  { %v600_v1 = vpop.f32.mrf.mxu2 }
 0x486   :  { %v601_v2 = vadd.f32 %v1778_v62, %v600_v1 }
 0x488   :  { %620 = vrot.lane.b32.xlu1 %v601_v2, %s1871_s5 }
 0x48d   :  { %v603_v3 = vpop.f32.mrf.mxu2 }
 0x48e   :  { %v604_v4 = vadd.f32 %v1778_v62, %v603_v3 }
 0x490   :  { %624 = vrot.lane.b32.xlu0 %v604_v4, %s1872_s22 }
 0x495   :  { %v605_v7 = vpop.f32.mrf.mxu2 }
 0x496   :  { %v606_v6 = vadd.f32 %v1778_v62, %v605_v7 }
 0x49d   :  { %v608_v8 = vpop.f32.mrf.mxu2 }
 0x49e   :  { %v609_v9 = vadd.f32 %v1778_v62, %v608_v8 }
 0x4a5   :  { %v610_v11 = vpop.f32.mrf.mxu2 }
 0x4a6   :  { %v611_v5 = vadd.f32 %v1778_v62, %v610_v11 }
 0x4a8   :  { %632 = vrot.lane.b32.xlu2 %v611_v5, %s1871_s5 }
 0x4ad   :  { %v613_v12 = vpop.f32.mrf.mxu2 }
 0x4ae   :  { %v614_v36 = vadd.f32 %v1778_v62, %v613_v12 }
 0x4b0   :  { %636 = vrot.lane.b32.xlu1 %v614_v36, %s1872_s22  ;;  %628 = vrot.lane.b32.xlu2 %v606_v6, %s1873_s24 }
 0x4b5   :  { %v615_v14 = vpop.f32.mrf.mxu2 }
 0x4b6   :  { %v616_v15 = vadd.f32 %v1778_v62, %v615_v14 }
 0x4b8   :  { %640 = vrot.lane.b32.xlu0 %v616_v15, %s1873_s24 }
 0x4fa   :  { %v621_v16 = vpop.permute.xlu1 %620 }
 0x4fb   :  { %v643_v18 = vsel %vm161_vm2, %v599_v0, %v621_v16 }
 0x502   :  { %v633_v42 = vpop.permute.xlu2 %632  ;;  %v625_v17 = vpop.permute.xlu0 %624 }
 0x503   :  { %v644_v20 = vsel %vm163_vm3, %v643_v18, %v625_v17  ;;  %v646_v41 = vsel %vm161_vm2, %v609_v9, %v633_v42 }
 0x50a   :  { %v629_v21 = vpop.permute.xlu2 %628 }
 0x50b   :  { %v645_v22 = vsel %vm165_vm4, %v644_v20, %v629_v21  ;;  %v654_v20 = vld [vmem:[%s2529_s12] ss:$2 sm:$0x3] }
 0x50c   :  { %v650_v23 = vmul.f32 %v649_v19, %v645_v22 }
 0x50e   :  { %v2184_v24 = vadd.f32 %v650_v23, %v2111_v10  ;;  %v655_v23 = vld [vmem:[%s2530_s13] ss:$2 sm:$0x3] }
 0x510   :  { %v656_v25 = vrot.slane %v2184_v24, 4  ;;  %v668_v27 = vmul.f32 %v2184_v24, %v2184_v24 }
 0x512   :  { %v657_v28 = vadd.f32 %v656_v25, %v2184_v24  ;;  %v670_v29 = vrot.slane %v668_v27, 4  ;;  %v725_v25 = vperm.slane %v654_v20, 0 }
 0x514   :  { %v658_v30 = vrot.slane %v657_v28, 2  ;;  %v671_v31 = vadd.f32 %v670_v29, %v668_v27 }
 0x516   :  { %v659_v32 = vadd.f32 %v658_v30, %v657_v28  ;;  %v672_v33 = vrot.slane %v671_v31, 2  ;;  %v726_v28 = vperm.slane %v654_v20, 1 }
 0x518   :  { %v660_v34 = vrot.slane %v659_v32, 1  ;;  %v673_v35 = vadd.f32 %v672_v33, %v671_v31  ;;  %v733_v33 = vperm.slane %v655_v23, 1 }
 0x51a   :  { %v674_v37 = vrot.slane %v673_v35, 1  ;;  %v661_v38 = vadd.f32 %v660_v34, %v659_v32  ;;  %v732_v32 = vperm.slane %v655_v23, 0 }
 0x51c   :  { %v675_v39 = vadd.f32 %v674_v37, %v673_v35 }
 0x51e   :  { %v682_v10 = vsel %vm327_vm8, %v661_v38, %v675_v39 }
 0x51f   :  { %684 = vrot.lane.b32.xlu1 %v682_v10, %s1871_s5 }
 0x522   :  { %v637_v40 = vpop.permute.xlu1 %636 }
 0x523   :  { %v647_v43 = vsel %vm163_vm3, %v646_v41, %v637_v40  ;;  %v1610_v40 = vld [vmem:[%s2520_s3 + $0x23] ss:$8 sm:$0x3]  ;;  %v1611_v41 = vld [vmem:[%s2520_s3 + $0x15] ss:$8 sm:$0x3] }
 0x52a   :  { %v641_v44 = vpop.permute.xlu0 %640 }
 0x52b   :  { %v648_v46 = vsel %vm165_vm4, %v647_v43, %v641_v44  ;;  %v1612_v43 = vld [vmem:[%s2520_s3 + $0x16] ss:$8 sm:$0x3]  ;;  %v741_v44 = vperm.slane %v1610_v40, 0 }
 0x52c   :  { %v651_v47 = vmul.f32 %v649_v19, %v648_v46  ;;  %v742_v46 = vperm.slane %v1610_v40, 1  ;;  %v1620_v40 = vld [vmem:[%s2520_s3 + $0x27] ss:$8 sm:$0x3] }
 0x52e   :  { %v653_v48 = vadd.f32 %v651_v47, %v2119_v13  ;;  %v756_v47 = vperm.slane %v1611_v41, 0 }
 0x530   :  { %v662_v49 = vrot.slane %v653_v48, 4  ;;  %v669_v50 = vmul.f32 %v653_v48, %v653_v48 }
 0x532   :  { %v663_v51 = vadd.f32 %v662_v49, %v653_v48  ;;  %v676_v52 = vrot.slane %v669_v50, 4 }
 0x534   :  { %v664_v53 = vrot.slane %v663_v51, 2  ;;  %v677_v26 = vadd.f32 %v676_v52, %v669_v50  ;;  %v774_v52 = vperm.slane %v1612_v43, 1 }
 0x536   :  { %v665_v54 = vadd.f32 %v664_v53, %v663_v51  ;;  %v678_v55 = vrot.slane %v677_v26, 2  ;;  %v773_v51 = vperm.slane %v1612_v43, 0 }
 0x538   :  { %v666_v56 = vrot.slane %v665_v54, 1  ;;  %v679_v57 = vadd.f32 %v678_v55, %v677_v26  ;;  %v1613_v26 = vld [vmem:[%s2520_s3 + $0x17] ss:$8 sm:$0x3] }
 0x53a   :  { %v680_v58 = vrot.slane %v679_v57, 1  ;;  %v667_v59 = vadd.f32 %v666_v56, %v665_v54 }
 0x53c   :  { %v681_v60 = vadd.f32 %v680_v58, %v679_v57 }
 0x53e   :  { %v683_v61 = vsel %vm327_vm8, %v667_v59, %v681_v60 }
 0x53f   :  { %686 = vrot.lane.b32.xlu2 %v683_v61, %s1871_s5 }
 0x591   :  { %v685_v62 = vpop.permute.xlu1 %684 }
 0x599   :  { %v687_v63 = vpop.permute.xlu2 %686 }
 0x59a   :  { %v688_v13 = vsel %vm220_vm7, %v685_v62, %v687_v63  ;;  %v689_v0 = vsel %vm220_vm7, %v687_v63, %v685_v62  ;;  %v784_v62 = vperm.slane %v1613_v26, 0  ;;  %v785_v63 = vperm.slane %v1613_v26, 1 }
 0x59b   :  { %v690_v1 = vadd.f32 %v689_v0, %v682_v10  ;;  %v691_v2 = vadd.f32 %v688_v13, %v683_v61  ;;  %v1614_v13 = vld [vmem:[%s2520_s3 + $0x20] ss:$8 sm:$0x3] }
 0x59d   :  { %692 = vrot.lane.b32.xlu0 %v690_v1, %s1872_s22  ;;  %694 = vrot.lane.b32.xlu1 %v691_v2, %s1872_s22 }
 0x60f   :  { %v693_v3 = vpop.permute.xlu0 %692  ;;  %v695_v4 = vpop.permute.xlu1 %694 }
 0x610   :  { %v696_v7 = vsel %vm202_vm6, %v693_v3, %v695_v4  ;;  %v697_v8 = vsel %vm202_vm6, %v695_v4, %v693_v3  ;;  %v1615_v4 = vld [vmem:[%s2520_s3 + $0x21] ss:$8 sm:$0x3] }
 0x611   :  { %v698_v9 = vadd.f32 %v697_v8, %v690_v1  ;;  %v699_v11 = vadd.f32 %v696_v7, %v691_v2  ;;  %v1616_v7 = vld [vmem:[%s2520_s3 + $0x22] ss:$8 sm:$0x3] }
 0x613   :  { %v700_v5 = vadd.f32 %v699_v11, %v698_v9  ;;  %v801_v11 = vperm.slane %v1614_v13, 0 }
 0x615   :  { %v701_v12 = vmul.f32 0.015625, %v700_v5  ;;  %v802_v5 = vperm.slane %v1614_v13, 1 }
 0x617   :  { %v702_v6 = vmul.f32 %v701_v12, %v701_v12  ;;  %v707_v21 = vperm.slane %v701_v12, 0 }
 0x619   :  { %v704_v36 = vrot.slane %v702_v6, 7  ;;  %v708_v29 = vsub.f32 %v2184_v24, %v707_v21  ;;  %v709_v30 = vsub.f32 %v653_v48, %v707_v21  ;;  %v757_v48 = vperm.slane %v1611_v41, 1  ;;  %v1618_v21 = vld [vmem:[%s2520_s3 + $0x25] ss:$8 sm:$0x3] }
 0x61a   :  { %v813_v6 = vperm.slane %v1615_v4, 1 }
 0x61b   :  { %v706_v14 = vsub.f32 %v701_v12, %v704_v36  ;;  %v812_v12 = vperm.slane %v1615_v4, 0 }
 0x61d   :  { %v710_v15 = vadd.f32 1e-05, %v706_v14 }
 0x61f   :  { %1804 = vrsqrt.f32 %v710_v15  ;;  %vm717_vm13 = vweird.f32 %v710_v15 }
 0x625   :  { %v1805_v42 = vpop.eup %1804 }
 0x626   :  { %v712_v16 = vmul.f32 %v1805_v42, %v710_v15  ;;  %vm718_vm12 = vweird.f32 %v1805_v42  ;;  %v1617_v15 = vld [vmem:[%s2520_s3 + $0x24] ss:$8 sm:$0x3] }
 0x627   :  { %vm719_vm14 = vmor %vm717_vm13, %vm718_vm12 }
 0x628   :  { %v713_v17 = vmul.f32 %v1805_v42, %v712_v16 }
 0x62a   :  { %v714_v18 = vmul.f32 0.5, %v713_v17  ;;  %v823_v17 = vperm.slane %v1616_v7, 0 }
 0x62c   :  { %v715_v19 = vsub.f32 1.5, %v714_v18  ;;  %v824_v18 = vperm.slane %v1616_v7, 1 }
 0x62e   :  { %v716_v22 = vmul.f32 %v1805_v42, %v715_v19 }
 0x630   :  { %v720_v27 = vsel %vm719_vm14, %v1805_v42, %v716_v22 }
 0x631   :  { %v721_v31 = vperm.slane %v720_v27, 1 }
 0x633   :  { %v722_v34 = vmul.f32 %v721_v31, %v708_v29  ;;  %v723_v35 = vmul.f32 %v721_v31, %v709_v30  ;;  %v835_v29 = vperm.slane %v1617_v15, 1 }
 0x635   :  { %v729_v37 = vmul.f32 %v725_v25, %v722_v34  ;;  %v730_v38 = vmul.f32 %v726_v28, %v723_v35  ;;  %v834_v28 = vperm.slane %v1617_v15, 0  ;;  %v845_v35 = vperm.slane %v1618_v21, 0 }
 0x637   :  { %v2215_v39 = vadd.f32 %v732_v32, %v729_v37  ;;  %v2217_v10 = vadd.f32 %v733_v33, %v730_v38  ;;  %v1619_v32 = vld [vmem:[%s2520_s3 + $0x26] ss:$8 sm:$0x3]  ;;  %v846_v37 = vperm.slane %v1618_v21, 1 }
 0x639   :  { %749 = vrot.lane.b32.xlu0 %v2217_v10, %s1872_s22  ;;  %764 = vrot.lane.b32.xlu1 %v2215_v39, %s1871_s5  ;;  %v745_v58 = vmul.f32 %v741_v44, %v2215_v39  ;;  %v746_v59 = vmul.f32 %v742_v46, %v2217_v10  ;;  %v788_v14 = vmul.f32 %v784_v62, %v2217_v10  ;;  %v856_v44 = vperm.slane %v1619_v32, 0 }
 0x63a   :  { %747 = vrot.lane.b32.xlu2 %v2215_v39, %s1872_s22  ;;  %v789_v16 = vmul.f32 %v785_v63, %v2215_v39  ;;  %v857_v46 = vperm.slane %v1619_v32, 1 }
 0x641   :  { %792 = vrot.lane.b32.xlu0 %v2215_v39, %s1873_s24  ;;  %794 = vrot.lane.b32.xlu1 %v2217_v10, %s1873_s24 }
 0x642   :  { %766 = vrot.lane.b32.xlu2 %v2217_v10, %s1871_s5 }
 0x694   :  { %v748_v24 = vpop.permute.xlu2 %747 }
 0x69c   :  { %v767_v49 = vpop.permute.xlu2 %766 }
 0x6ab   :  { %v750_v50 = vpop.permute.xlu0 %749  ;;  %v765_v53 = vpop.permute.xlu1 %764 }
 0x6ac   :  { %v2245_v54 = vsel %vm202_vm6, %v748_v24, %v750_v50  ;;  %v2249_v55 = vsel %vm202_vm6, %v750_v50, %v748_v24  ;;  %v2253_v56 = vsel %vm220_vm7, %v765_v53, %v767_v49  ;;  %v2257_v57 = vsel %vm220_vm7, %v767_v49, %v765_v53 }
 0x6ad   :  { %v760_v60 = vmul.f32 %v756_v47, %v2245_v54  ;;  %v761_v61 = vmul.f32 %v757_v48, %v2249_v55  ;;  %v777_v2 = vmul.f32 %v773_v51, %v2253_v56  ;;  %v778_v3 = vmul.f32 %v774_v52, %v2257_v57  ;;  %v1621_v47 = vld [vmem:[%s2520_s3 + $0x30] ss:$8 sm:$0x3] }
 0x6ae   :  { %v816_v30 = vmul.f32 %v812_v12, %v2249_v55  ;;  %v817_v31 = vmul.f32 %v813_v6, %v2245_v54  ;;  %v827_v38 = vmul.f32 %v823_v17, %v2257_v57  ;;  %v828_v24 = vmul.f32 %v824_v18, %v2253_v56 }
 0x6af   :  { %v762_v0 = vadd.f32 %v760_v60, %v745_v58  ;;  %v763_v1 = vadd.f32 %v761_v61, %v746_v59  ;;  %v867_v52 = vperm.slane %v1620_v40, 0  ;;  %v868_v53 = vperm.slane %v1620_v40, 1  ;;  %v1622_v61 = vld [vmem:[%s2520_s3 + $0x31] ss:$8 sm:$0x3]  ;;  %s1624_s3 = sld [smem:[#allocation2 + $0x80]] }
 0x6b0   :  { %v849_v26 = vmul.f32 %v845_v35, %v2245_v54  ;;  %v850_v58 = vmul.f32 %v846_v37, %v2249_v55  ;;  %v878_v62 = vperm.slane %v1621_v47, 0  ;;  %v879_v63 = vperm.slane %v1621_v47, 1 }
 0x6b1   :  { %v779_v8 = vadd.f32 %v777_v2, %v762_v0  ;;  %v780_v9 = vadd.f32 %v778_v3, %v763_v1  ;;  %v860_v13 = vmul.f32 %v856_v44, %v2253_v56  ;;  %v861_v0 = vmul.f32 %v857_v46, %v2257_v57 }
 0x6b2   :  { %v871_v3 = vmul.f32 %v867_v52, %v2217_v10  ;;  %v872_v4 = vmul.f32 %v868_v53, %v2215_v39  ;;  %v889_v7 = vperm.slane %v1622_v61, 0 }
 0x6b3   :  { %v793_v36 = vpop.permute.xlu0 %792  ;;  %v795_v42 = vpop.permute.xlu1 %794  ;;  %v790_v22 = vadd.f32 %v788_v14, %v779_v8  ;;  %v791_v23 = vadd.f32 %v789_v16, %v780_v9  ;;  %v890_v8 = vperm.slane %v1622_v61, 1  ;;  %v1623_v9 = vld [vmem:[%s2521_s4 + $0x1] ss:$2 sm:$0x3] }
 0x6b4   :  { %v796_v19 = vsel %vm185_vm5, %v793_v36, %v795_v42  ;;  %v797_v20 = vsel %vm185_vm5, %v795_v42, %v793_v36  ;;  %v900_v14 = vperm.slane %v1623_v9, 0  ;;  %v901_v57 = vperm.slane %v1623_v9, 1 }
 0x6b5   :  { %v805_v25 = vmul.f32 %v801_v11, %v797_v20  ;;  %v806_v27 = vmul.f32 %v802_v5, %v796_v19  ;;  %v838_v50 = vmul.f32 %v834_v28, %v796_v19  ;;  %v839_v51 = vmul.f32 %v835_v29, %v797_v20 }
 0x6b6   :  { %v882_v36 = vmul.f32 %v878_v62, %v797_v20  ;;  %v883_v56 = vmul.f32 %v879_v63, %v796_v19  ;;  %v893_v15 = vmul.f32 %v889_v7, %v2249_v55  ;;  %v894_v42 = vmul.f32 %v890_v8, %v2245_v54 }
 0x6b7   :  { %v807_v33 = vadd.f32 %v805_v25, %v790_v22  ;;  %v808_v34 = vadd.f32 %v806_v27, %v791_v23  ;;  %vm1548_vm5 = vcmask 64512  }
 0x6b9   :  { %v818_v41 = vadd.f32 %v816_v30, %v807_v33  ;;  %v819_v43 = vadd.f32 %v817_v31, %v808_v34 }
 0x6bb   :  { %v829_v48 = vadd.f32 %v827_v38, %v818_v41  ;;  %v830_v49 = vadd.f32 %v828_v24, %v819_v43  ;;  %v925_v24 = vstv %s1624_s3 }
 0x6bd   :  { %v840_v59 = vadd.f32 %v838_v50, %v829_v48  ;;  %v841_v60 = vadd.f32 %v839_v51, %v830_v49 }
 0x6bf   :  { %v851_v1 = vadd.f32 %v849_v26, %v840_v59  ;;  %v852_v2 = vadd.f32 %v850_v58, %v841_v60 }
 0x6c1   :  { %v862_v11 = vadd.f32 %v860_v13, %v851_v1  ;;  %v863_v5 = vadd.f32 %v861_v0, %v852_v2 }
 0x6c3   :  { %v873_v12 = vadd.f32 %v871_v3, %v862_v11  ;;  %v874_v6 = vadd.f32 %v872_v4, %v863_v5 }
 0x6c5   :  { %v884_v16 = vadd.f32 %v882_v36, %v873_v12  ;;  %v885_v17 = vadd.f32 %v883_v56, %v874_v6 }
 0x6c7   :  { %v895_v18 = vadd.f32 %v893_v15, %v884_v16  ;;  %v896_v21 = vadd.f32 %v894_v42, %v885_v17 }
 0x6c9   :  { %v904_v22 = vadd.f32 %v900_v14, %v895_v18  ;;  %v905_v23 = vadd.f32 %v901_v57, %v896_v21 }
 0x6cb   :  { %v909_v25 = vmul.f32 0.044715, %v904_v22  ;;  %v910_v27 = vmul.f32 0.044715, %v905_v23  ;;  %v907_v34 = vmul.f32 0.5, %v904_v22  ;;  %v908_v37 = vmul.f32 0.5, %v905_v23 }
 0x6cd   :  { %v911_v28 = vmul.f32 %v909_v25, %v904_v22  ;;  %v912_v29 = vmul.f32 %v910_v27, %v905_v23 }
 0x6cf   :  { %v913_v30 = vmul.f32 %v911_v28, %v904_v22  ;;  %v914_v31 = vmul.f32 %v912_v29, %v905_v23 }
 0x6d1   :  { %v915_v20 = vadd.f32 %v913_v30, %v904_v22  ;;  %v916_v19 = vadd.f32 %v914_v31, %v905_v23 }
 0x6d3   :  { %v917_v32 = vmul.f32 0.7978846, %v915_v20  ;;  %v918_v33 = vmul.f32 0.7978846, %v916_v19 }
 0x6d5   :  { %1806 = vtanh.f32 %v917_v32 }
 0x6d6   :  { %1808 = vtanh.f32 %v918_v33 }
 0x6db   :  { %v1807_v54 = vpop.eup %1806 }
 0x6dc   :  { %v1809_v55 = vpop.eup %1808  ;;  %v921_v35 = vadd.f32 1.0, %v1807_v54 }
 0x6dd   :  { %v922_v38 = vadd.f32 1.0, %v1809_v55 }
 0x6de   :  { %v923_v40 = vmul.f32 %v921_v35, %v907_v34  ;;  %v1625_v35 = vld [vmem:[%s2523_s6 + $0x1] ss:$2 sm:$0x3] }
 0x6df   :  { %v924_v41 = vmul.f32 %v922_v38, %v908_v37  ;;  %v1626_v38 = vld [vmem:[%s2524_s7 + $0x1] ss:$2 sm:$0x3] }
 0x6e0   :  { %v926_v43 = vmul.f32 %v925_v24, %v923_v40 }
 0x6e1   :  { %v927_v44 = vmul.f32 %v925_v24, %v924_v41  ;;  %v1003_v41 = vperm.slane %v1625_v35, 0 }
 0x6e2   :  { %v2314_v46 = vadd.f32 %v926_v43, %v2215_v39 }
 0x6e3   :  { %v2317_v47 = vadd.f32 %v927_v44, %v2217_v10  ;;  %v1010_v44 = vperm.slane %v1626_v38, 0 }
 0x6e4   :  { %v934_v48 = vrot.slane %v2314_v46, 4  ;;  %v946_v49 = vmul.f32 %v2314_v46, %v2314_v46 }
 0x6e5   :  { %v940_v50 = vrot.slane %v2317_v47, 4  ;;  %v947_v51 = vmul.f32 %v2317_v47, %v2317_v47 }
 0x6e6   :  { %v935_v52 = vadd.f32 %v934_v48, %v2314_v46  ;;  %v948_v53 = vrot.slane %v946_v49, 4 }
 0x6e7   :  { %v941_v26 = vadd.f32 %v940_v50, %v2317_v47  ;;  %v954_v39 = vrot.slane %v947_v51, 4 }
 0x6e8   :  { %v936_v58 = vrot.slane %v935_v52, 2  ;;  %v949_v59 = vadd.f32 %v948_v53, %v946_v49  ;;  %v1011_v53 = vperm.slane %v1626_v38, 1 }
 0x6e9   :  { %v942_v10 = vrot.slane %v941_v26, 2  ;;  %v955_v60 = vadd.f32 %v954_v39, %v947_v51  ;;  %v1744_v39 = vld [vmem:[%s2525_s8 + $0x10] sm:$0xff] }
 0x6ea   :  { %v937_v61 = vadd.f32 %v936_v58, %v935_v52  ;;  %v950_v62 = vrot.slane %v949_v59, 2  ;;  %v1004_v52 = vperm.slane %v1625_v35, 1 }
 0x6eb   :  { %v943_v63 = vadd.f32 %v942_v10, %v941_v26  ;;  %v956_v13 = vrot.slane %v955_v60, 2 }
 0x6ec   :  { %v938_v0 = vrot.slane %v937_v61, 1  ;;  %v951_v1 = vadd.f32 %v950_v62, %v949_v59 }
 0x6ed   :  { %v944_v2 = vrot.slane %v943_v63, 1  ;;  %v957_v3 = vadd.f32 %v956_v13, %v955_v60 }
 0x6ee   :  { %v952_v4 = vrot.slane %v951_v1, 1  ;;  %v939_v8 = vadd.f32 %v938_v0, %v937_v61 }
 0x6ef   :  { %v958_v7 = vrot.slane %v957_v3, 1  ;;  %v945_v11 = vadd.f32 %v944_v2, %v943_v63  ;;  %v1749_v2 = vld [vmem:[%s2527_s10 + $0x38] sm:$0xff] }
 0x6f0   :  { %v953_v9 = vadd.f32 %v952_v4, %v951_v1  ;;  %1227 = vmatpush.bf16.msrb.mxu0 %v1749_v2  ;;  %v1747_v4 = vld [vmem:[%s2527_s10 + $0x28] sm:$0xff] }
 0x6f1   :  { %v959_v5 = vadd.f32 %v958_v7, %v957_v3  ;;  %v1748_v3 = vld [vmem:[%s2527_s10 + $0x30] sm:$0xff]  ;;  %v2389_v7 = vld [vmem:[%s2526_s9 + $0x1] ss:$0 sm:$0xff] }
 0x6f2   :  { %v960_v12 = vsel %vm327_vm8, %v939_v8, %v953_v9  ;;  %v1746_v8 = vld [vmem:[%s2527_s10 + $0x20] sm:$0xff] }
 0x6f3   :  { %v961_v6 = vsel %vm327_vm8, %v945_v11, %v959_v5  ;;  %962 = vrot.lane.b32.xlu2 %v960_v12, %s1871_s5 }
 0x6f4   :  { %964 = vrot.lane.b32.xlu0 %v961_v6, %s1871_s5  ;;  %1228 = vmatpush.bf16.msrb.mxu0 %v1748_v3 }
 0x6f8   :  { %1229 = vmatpush.bf16.msrb.mxu0 %v1747_v4 }
 0x6fc   :  { %1230 = vmatpush.bf16.msrb.mxu0 %v1746_v8 }
 0x74d   :  { %v963_v36 = vpop.permute.xlu2 %962 }
 0x766   :  { %v965_v56 = vpop.permute.xlu0 %964 }
 0x767   :  { %v966_v14 = vsel %vm220_vm7, %v963_v36, %v965_v56  ;;  %v967_v57 = vsel %vm220_vm7, %v965_v56, %v963_v36 }
 0x768   :  { %v968_v15 = vadd.f32 %v967_v57, %v960_v12  ;;  %v969_v42 = vadd.f32 %v966_v14, %v961_v6 }
 0x76a   :  { %970 = vrot.lane.b32.xlu1 %v968_v15, %s1872_s22  ;;  %972 = vrot.lane.b32.xlu2 %v969_v42, %s1872_s22 }
 0x7c4   :  { %v973_v16 = vpop.permute.xlu2 %972 }
 0x7dc   :  { %v971_v17 = vpop.permute.xlu1 %970 }
 0x7dd   :  { %v974_v18 = vsel %vm202_vm6, %v971_v17, %v973_v16  ;;  %v975_v21 = vsel %vm202_vm6, %v973_v16, %v971_v17 }
 0x7de   :  { %v976_v22 = vadd.f32 %v975_v21, %v968_v15  ;;  %v977_v23 = vadd.f32 %v974_v18, %v969_v42 }
 0x7e0   :  { %v978_v25 = vadd.f32 %v977_v23, %v976_v22 }
 0x7e2   :  { %v979_v27 = vmul.f32 0.015625, %v978_v25 }
 0x7e4   :  { %v980_v28 = vmul.f32 %v979_v27, %v979_v27  ;;  %v985_v55 = vperm.slane %v979_v27, 0 }
 0x7e6   :  { %v982_v29 = vrot.slane %v980_v28, 7  ;;  %v986_v24 = vsub.f32 %v2314_v46, %v985_v55  ;;  %v987_v48 = vsub.f32 %v2317_v47, %v985_v55  ;;  %v1745_v47 = vld [vmem:[%s2525_s8 + $0x18] sm:$0xff] }
 0x7e7   :  { %1077 = vmatpush.bf16.msra.mxu3 %v1745_v47 }
 0x7e8   :  { %v984_v30 = vsub.f32 %v979_v27, %v982_v29 }
 0x7ea   :  { %v988_v31 = vadd.f32 1e-05, %v984_v30 }
 0x7eb   :  { %1078 = vmatpush.bf16.msra.mxu3 %v1744_v39 }
 0x7ec   :  { %1810 = vrsqrt.f32 %v988_v31  ;;  %vm995_vm0 = vweird.f32 %v988_v31 }
 0x7f2   :  { %v1811_v20 = vpop.eup %1810 }
 0x7f3   :  { %v990_v19 = vmul.f32 %v1811_v20, %v988_v31  ;;  %vm996_vm15 = vweird.f32 %v1811_v20 }
 0x7f4   :  { %vm997_vm1 = vmor %vm995_vm0, %vm996_vm15 }
 0x7f5   :  { %v991_v32 = vmul.f32 %v1811_v20, %v990_v19 }
 0x7f7   :  { %v992_v33 = vmul.f32 0.5, %v991_v32 }
 0x7f9   :  { %v993_v54 = vsub.f32 1.5, %v992_v33 }
 0x7fb   :  { %v994_v34 = vmul.f32 %v1811_v20, %v993_v54 }
 0x7fd   :  { %v998_v37 = vsel %vm997_vm1, %v1811_v20, %v994_v34 }
 0x7fe   :  { %v999_v40 = vperm.slane %v998_v37, 1 }
 0x800   :  { %v1000_v43 = vmul.f32 %v999_v40, %v986_v24  ;;  %v1001_v50 = vmul.f32 %v999_v40, %v987_v48 }
 0x802   :  { %v1007_v49 = vmul.f32 %v1003_v41, %v1000_v43  ;;  %v1008_v46 = vmul.f32 %v1004_v52, %v1001_v50 }
 0x804   :  { %v2349_v51 = vadd.f32 %v1010_v44, %v1007_v49  ;;  %v2357_v26 = vadd.f32 %v1011_v53, %v1008_v46 }
 0x806   :  { %1023 = vrot.lane.b32.xlu2 %v2349_v51, %s1871_s5  ;;  %1020 = vrot.lane.b32.xlu1 %v2349_v51, %s1872_s22 }
 0x807   :  { %1017 = vrot.lane.b32.xlu0 %v2349_v51, %s1873_s24 }
 0x80e   :  { %1033 = vrot.lane.b32.xlu2 %v2357_v26, %s1871_s5  ;;  %1030 = vrot.lane.b32.xlu1 %v2357_v26, %s1872_s22 }
 0x80f   :  { %1027 = vrot.lane.b32.xlu0 %v2357_v26, %s1873_s24 }
 0x860   :  { %v1024_v60 = vpop.permute.xlu2 %1023 }
 0x868   :  { %v1034_v0 = vpop.permute.xlu2 %1033 }
 0x878   :  { %v1021_v10 = vpop.permute.xlu1 %1020 }
 0x879   :  { %v1018_v58 = vpop.permute.xlu0 %1017  ;;  %v1037_v61 = vpack.c.bf16 %v1024_v60, %v1021_v10 }
 0x87a   :  { %v1036_v59 = vpack.c.bf16 %v1018_v58, %v2349_v51 }
 0x87c   :  { %1639 = vmatmul.msk.bf16.vlgmr.msra.gmra.mxu3 %vm161_vm2, %v1036_v59 }
 0x880   :  { %v1031_v13 = vpop.permute.xlu1 %1030 }
 0x881   :  { %v1028_v62 = vpop.permute.xlu0 %1027  ;;  %v1039_v1 = vpack.c.bf16 %v1034_v0, %v1031_v13 }
 0x882   :  { %v1038_v63 = vpack.c.bf16 %v1028_v62, %v2357_v26 }
 0x88c   :  { %1640 = vmatmul.msk.bf16.gmra.mxu3 %vm161_vm2, %v1037_v61 }
 0x89c   :  { %1641 = vmatmul.msk.bf16.gmra.mxu3 %vm161_vm2, %v1038_v63 }
 0x8ac   :  { %1642 = vmatmul.msk.bf16.gmra.mxu3 %vm161_vm2, %v1039_v1 }
 0x8ff   :  { %v1080_v9 = vpop.f32.mrf.mxu3 }
 0x900   :  { %v1081_v11 = vadd.f32 %v2389_v7, %v1080_v9 }
 0x902   :  { %v1108_v5 = vmul.f32 0.044715, %v1081_v11  ;;  %v1100_v33 = vmul.f32 0.5, %v1081_v11 }
 0x904   :  { %v1116_v12 = vmul.f32 %v1108_v5, %v1081_v11 }
 0x906   :  { %v1124_v6 = vmul.f32 %v1116_v12, %v1081_v11 }
 0x907   :  { %v1082_v36 = vpop.f32.mrf.mxu3 }
 0x908   :  { %v1132_v56 = vadd.f32 %v1124_v6, %v1081_v11  ;;  %v1083_v14 = vadd.f32 %v2389_v7, %v1082_v36 }
 0x90a   :  { %v1109_v57 = vmul.f32 0.044715, %v1083_v14  ;;  %v1140_v15 = vmul.f32 0.7978846, %v1132_v56  ;;  %v1101_v54 = vmul.f32 0.5, %v1083_v14 }
 0x90c   :  { %v1117_v42 = vmul.f32 %v1109_v57, %v1083_v14  ;;  %1812 = vtanh.f32 %v1140_v15 }
 0x90e   :  { %v1125_v16 = vmul.f32 %v1117_v42, %v1083_v14 }
 0x90f   :  { %v1085_v17 = vpop.f32.mrf.mxu3 }
 0x910   :  { %v1133_v18 = vadd.f32 %v1125_v16, %v1083_v14  ;;  %v1086_v21 = vadd.f32 %v2389_v7, %v1085_v17 }
 0x912   :  { %v1141_v22 = vmul.f32 0.7978846, %v1133_v18  ;;  %v1110_v23 = vmul.f32 0.044715, %v1086_v21  ;;  %v1813_v27 = vpop.eup %1812  ;;  %v1102_v60 = vmul.f32 0.5, %v1086_v21 }
 0x913   :  { %v1156_v20 = vadd.f32 1.0, %v1813_v27 }
 0x914   :  { %v1118_v25 = vmul.f32 %v1110_v23, %v1086_v21  ;;  %1814 = vtanh.f32 %v1141_v22 }
 0x915   :  { %v1164_v37 = vmul.f32 %v1156_v20, %v1100_v33 }
 0x916   :  { %v1126_v28 = vmul.f32 %v1118_v25, %v1086_v21 }
 0x917   :  { %v1087_v29 = vpop.f32.mrf.mxu3 }
 0x918   :  { %v1088_v30 = vadd.f32 %v2389_v7, %v1087_v29  ;;  %v1134_v31 = vadd.f32 %v1126_v28, %v1086_v21 }
 0x91a   :  { %v1815_v19 = vpop.eup %1814  ;;  %v1111_v32 = vmul.f32 0.044715, %v1088_v30  ;;  %v1142_v35 = vmul.f32 0.7978846, %v1134_v31  ;;  %v1103_v61 = vmul.f32 0.5, %v1088_v30 }
 0x91b   :  { %v1157_v55 = vadd.f32 1.0, %v1815_v19 }
 0x91c   :  { %v1119_v34 = vmul.f32 %v1111_v32, %v1088_v30  ;;  %1816 = vtanh.f32 %v1142_v35 }
 0x91d   :  { %v1165_v38 = vmul.f32 %v1157_v55, %v1101_v54 }
 0x91e   :  { %v1127_v24 = vmul.f32 %v1119_v34, %v1088_v30 }
 0x91f   :  { %v1090_v40 = vpop.f32.mrf.mxu3  ;;  %v1172_v41 = vpack.c.bf16 %v1165_v38, %v1164_v37  ;;  %v1780_v37 = vld [vmem:[%s2528_s11 + $0x1] ss:$0 sm:$0xff]  ;;  %s1671_s11 = sld [smem:[#allocation2 + $0x81]] }
 0x920   :  { %v1091_v43 = vadd.f32 %v2389_v7, %v1090_v40  ;;  %v1135_v44 = vadd.f32 %v1127_v24, %v1088_v30 }
 0x921   :  { %1667 = vmatmul.msk.bf16.vlgmr.msrb.gmra.mxu0 %vm163_vm3, %v1172_v41 }
 0x922   :  { %v1112_v48 = vmul.f32 0.044715, %v1091_v43  ;;  %v1143_v49 = vmul.f32 0.7978846, %v1135_v44  ;;  %v1817_v52 = vpop.eup %1816  ;;  %v1104_v17 = vmul.f32 0.5, %v1091_v43 }
 0x923   :  { %v1158_v58 = vadd.f32 1.0, %v1817_v52 }
 0x924   :  { %v1120_v50 = vmul.f32 %v1112_v48, %v1091_v43  ;;  %1818 = vtanh.f32 %v1143_v49 }
 0x925   :  { %v1166_v0 = vmul.f32 %v1158_v58, %v1102_v60 }
 0x926   :  { %v1128_v46 = vmul.f32 %v1120_v50, %v1091_v43 }
 0x927   :  { %v1092_v53 = vpop.f32.mrf.mxu3 }
 0x928   :  { %v1093_v47 = vadd.f32 %v2389_v7, %v1092_v53  ;;  %v1136_v39 = vadd.f32 %v1128_v46, %v1091_v43 }
 0x92a   :  { %v1819_v59 = vpop.eup %1818  ;;  %v1113_v10 = vmul.f32 0.044715, %v1093_v47  ;;  %v1144_v13 = vmul.f32 0.7978846, %v1136_v39  ;;  %v1105_v18 = vmul.f32 0.5, %v1093_v47 }
 0x92b   :  { %v1159_v62 = vadd.f32 1.0, %v1819_v59 }
 0x92c   :  { %v1121_v63 = vmul.f32 %v1113_v10, %v1093_v47  ;;  %1820 = vtanh.f32 %v1144_v13 }
 0x92d   :  { %v1167_v1 = vmul.f32 %v1159_v62, %v1103_v61 }
 0x92e   :  { %v1129_v2 = vmul.f32 %v1121_v63, %v1093_v47  ;;  %v1283_v63 = vstv %s1671_s11 }
 0x92f   :  { %v1095_v3 = vpop.f32.mrf.mxu3  ;;  %v1173_v4 = vpack.c.bf16 %v1167_v1, %v1166_v0 }
 0x930   :  { %v1096_v8 = vadd.f32 %v2389_v7, %v1095_v3  ;;  %v1137_v9 = vadd.f32 %v1129_v2, %v1093_v47 }
 0x931   :  { %1668 = vmatmul.msk.bf16.gmra.mxu0 %vm163_vm3, %v1173_v4 }
 0x932   :  { %v1114_v11 = vmul.f32 0.044715, %v1096_v8  ;;  %v1145_v5 = vmul.f32 0.7978846, %v1137_v9  ;;  %v1821_v6 = vpop.eup %1820  ;;  %v1106_v32 = vmul.f32 0.5, %v1096_v8 }
 0x933   :  { %v1160_v15 = vadd.f32 1.0, %v1821_v6 }
 0x934   :  { %v1122_v12 = vmul.f32 %v1114_v11, %v1096_v8  ;;  %1822 = vtanh.f32 %v1145_v5 }
 0x935   :  { %v1168_v25 = vmul.f32 %v1160_v15, %v1104_v17 }
 0x936   :  { %v1130_v36 = vmul.f32 %v1122_v12, %v1096_v8 }
 0x937   :  { %v1097_v56 = vpop.f32.mrf.mxu3 }
 0x938   :  { %v1098_v14 = vadd.f32 %v2389_v7, %v1097_v56  ;;  %v1138_v57 = vadd.f32 %v1130_v36, %v1096_v8 }
 0x93a   :  { %v1823_v42 = vpop.eup %1822  ;;  %v1115_v16 = vmul.f32 0.044715, %v1098_v14  ;;  %v1146_v23 = vmul.f32 0.7978846, %v1138_v57  ;;  %v1107_v33 = vmul.f32 0.5, %v1098_v14 }
 0x93b   :  { %v1161_v21 = vadd.f32 1.0, %v1823_v42 }
 0x93c   :  { %v1123_v22 = vmul.f32 %v1115_v16, %v1098_v14  ;;  %1824 = vtanh.f32 %v1146_v23 }
 0x93d   :  { %v1169_v27 = vmul.f32 %v1161_v21, %v1105_v18 }
 0x93e   :  { %v1131_v28 = vmul.f32 %v1123_v22, %v1098_v14 }
 0x93f   :  { %v1174_v29 = vpack.c.bf16 %v1169_v27, %v1168_v25 }
 0x940   :  { %v1139_v30 = vadd.f32 %v1131_v28, %v1098_v14 }
 0x941   :  { %1669 = vmatmul.msk.bf16.gmra.mxu0 %vm163_vm3, %v1174_v29 }
 0x942   :  { %v1147_v31 = vmul.f32 0.7978846, %v1139_v30  ;;  %v1825_v7 = vpop.eup %1824 }
 0x943   :  { %v1162_v20 = vadd.f32 1.0, %v1825_v7 }
 0x944   :  { %1826 = vtanh.f32 %v1147_v31 }
 0x945   :  { %v1170_v55 = vmul.f32 %v1162_v20, %v1106_v32 }
 0x94a   :  { %v1827_v19 = vpop.eup %1826 }
 0x94b   :  { %v1163_v54 = vadd.f32 1.0, %v1827_v19 }
 0x94d   :  { %v1171_v34 = vmul.f32 %v1163_v54, %v1107_v33 }
 0x94f   :  { %v1175_v35 = vpack.c.bf16 %v1171_v34, %v1170_v55 }
 0x951   :  { %1670 = vmatmul.msk.bf16.gmra.mxu0 %vm163_vm3, %v1175_v35 }
 0x99e   :  { %v1232_v38 = vpop.f32.mrf.mxu0 }
 0x99f   :  { %v1233_v24 = vadd.f32 %v1780_v37, %v1232_v38 }
 0x9a6   :  { %v1234_v40 = vpop.f32.mrf.mxu0 }
 0x9a7   :  { %v1235_v41 = vadd.f32 %v1780_v37, %v1234_v40 }
 0x9a9   :  { %1254 = vrot.lane.b32.xlu0 %v1235_v41, %s1871_s5 }
 0x9ae   :  { %v1237_v43 = vpop.f32.mrf.mxu0 }
 0x9af   :  { %v1238_v44 = vadd.f32 %v1780_v37, %v1237_v43  ;;  %v1765_v43 = vld [vmem:[%s2531_s14 + $0x78] sm:$0xff] }
 0x9b0   :  { %1521 = vmatpush.bf16.msrb.mxu3 %v1765_v43 }
 0x9b1   :  { %1258 = vrot.lane.b32.xlu2 %v1238_v44, %s1872_s22  ;;  %v1757_v44 = vld [vmem:[%s2531_s14 + $0x38] sm:$0xff] }
 0x9b2   :  { %1508 = vmatpush.bf16.msrb.mxu1 %v1757_v44 }
 0x9b6   :  { %v1239_v48 = vpop.f32.mrf.mxu0 }
 0x9b7   :  { %v1240_v47 = vadd.f32 %v1780_v37, %v1239_v48  ;;  %v1764_v48 = vld [vmem:[%s2531_s14 + $0x70] sm:$0xff] }
 0x9b8   :  { %1522 = vmatpush.bf16.msrb.mxu3 %v1764_v48 }
 0x9be   :  { %v1242_v49 = vpop.f32.mrf.mxu0 }
 0x9bf   :  { %v1243_v50 = vadd.f32 %v1780_v37, %v1242_v49  ;;  %v1756_v49 = vld [vmem:[%s2531_s14 + $0x30] sm:$0xff] }
 0x9c0   :  { %1509 = vmatpush.bf16.msrb.mxu1 %v1756_v49 }
 0x9c6   :  { %v1244_v52 = vpop.f32.mrf.mxu0 }
 0x9c7   :  { %v1245_v46 = vadd.f32 %v1780_v37, %v1244_v52  ;;  %v1755_v52 = vld [vmem:[%s2531_s14 + $0x28] sm:$0xff] }
 0x9c8   :  { %1510 = vmatpush.bf16.msrb.mxu1 %v1755_v52 }
 0x9c9   :  { %1266 = vrot.lane.b32.xlu1 %v1245_v46, %s1871_s5  ;;  %v1762_v46 = vld [vmem:[%s2531_s14 + $0x60] sm:$0xff] }
 0x9ce   :  { %v1247_v53 = vpop.f32.mrf.mxu0 }
 0x9cf   :  { %v1248_v39 = vadd.f32 %v1780_v37, %v1247_v53  ;;  %v1754_v53 = vld [vmem:[%s2531_s14 + $0x20] sm:$0xff] }
 0x9d0   :  { %1511 = vmatpush.bf16.msrb.mxu1 %v1754_v53 }
 0x9d1   :  { %1270 = vrot.lane.b32.xlu0 %v1248_v39, %s1872_s22  ;;  %1262 = vrot.lane.b32.xlu1 %v1240_v47, %s1873_s24  ;;  %v1761_v47 = vld [vmem:[%s2531_s14 + $0x58] sm:$0xff] }
 0x9d2   :  { %v1753_v39 = vld [vmem:[%s2531_s14 + $0x18] sm:$0xff] }
 0x9d4   :  { %1512 = vmatpush.bf16.msrb.mxu1 %v1753_v39 }
 0x9d6   :  { %v1249_v58 = vpop.f32.mrf.mxu0 }
 0x9d7   :  { %v1250_v59 = vadd.f32 %v1780_v37, %v1249_v58  ;;  %v1760_v58 = vld [vmem:[%s2531_s14 + $0x50] sm:$0xff] }
 0x9d9   :  { %1274 = vrot.lane.b32.xlu2 %v1250_v59, %s1873_s24  ;;  %v1752_v59 = vld [vmem:[%s2531_s14 + $0x10] sm:$0xff] }
 0x9da   :  { %1513 = vmatpush.bf16.msrb.mxu1 %v1752_v59 }
 0xa0b   :  { %v1259_v61 = vpop.permute.xlu2 %1258 }
 0xa1b   :  { %v1255_v10 = vpop.permute.xlu0 %1254 }
 0xa1c   :  { %v1277_v62 = vsel %vm161_vm2, %v1233_v24, %v1255_v10 }
 0xa1d   :  { %v1278_v1 = vsel %vm163_vm3, %v1277_v62, %v1259_v61 }
 0xa33   :  { %v1275_v3 = vpop.permute.xlu2 %1274 }
 0xa3b   :  { %v1267_v60 = vpop.permute.xlu1 %1266 }
 0xa3c   :  { %v1280_v13 = vsel %vm161_vm2, %v1243_v50, %v1267_v60  ;;  %v1763_v50 = vld [vmem:[%s2531_s14 + $0x68] sm:$0xff] }
 0xa3d   :  { %1523 = vmatpush.bf16.msrb.mxu3 %v1763_v50 }
 0xa41   :  { %1524 = vmatpush.bf16.msrb.mxu3 %v1762_v46 }
 0xa43   :  { %v1263_v0 = vpop.permute.xlu1 %1262  ;;  %v1271_v2 = vpop.permute.xlu0 %1270 }
 0xa44   :  { %v1279_v4 = vsel %vm165_vm4, %v1278_v1, %v1263_v0  ;;  %v1281_v8 = vsel %vm163_vm3, %v1280_v13, %v1271_v2  ;;  %v1759_v0 = vld [vmem:[%s2531_s14 + $0x48] sm:$0xff] }
 0xa45   :  { %v1284_v9 = vmul.f32 %v1283_v63, %v1279_v4  ;;  %v1282_v11 = vsel %vm165_vm4, %v1281_v8, %v1275_v3  ;;  %1525 = vmatpush.bf16.msrb.mxu3 %v1761_v47  ;;  %v1751_v1 = vld [vmem:[%s2531_s14 + $0x8] sm:$0xff]  ;;  %v1750_v4 = vld [vmem:[%s2531_s14] sm:$0xff] }
 0xa46   :  { %v1285_v5 = vmul.f32 %v1283_v63, %v1282_v11  ;;  %1514 = vmatpush.bf16.msrb.mxu1 %v1751_v1 }
 0xa47   :  { %v2422_v12 = vadd.f32 %v1284_v9, %v2349_v51 }
 0xa48   :  { %v2425_v6 = vadd.f32 %v1285_v5, %v2357_v26  ;;  %v1534_v5 = vld [vmem:[%s2533_s16] sm:$0xff] }
 0xa49   :  { %v1292_v36 = vrot.slane %v2422_v12, 4  ;;  %v1304_v56 = vmul.f32 %v2422_v12, %v2422_v12  ;;  %1526 = vmatpush.bf16.msrb.mxu3 %v1760_v58 }
 0xa4a   :  { %v1298_v14 = vrot.slane %v2425_v6, 4  ;;  %v1305_v57 = vmul.f32 %v2425_v6, %v2425_v6  ;;  %1515 = vmatpush.bf16.msrb.mxu1 %v1750_v4 }
 0xa4b   :  { %v1293_v15 = vadd.f32 %v1292_v36, %v2422_v12  ;;  %v1306_v42 = vrot.slane %v1304_v56, 4  ;;  %v1541_v36 = vld [vmem:[%s2534_s17] sm:$0xff] }
 0xa4c   :  { %v1299_v16 = vadd.f32 %v1298_v14, %v2425_v6  ;;  %v1312_v51 = vrot.slane %v1305_v57, 4 }
 0xa4d   :  { %v1294_v17 = vrot.slane %v1293_v15, 2  ;;  %v1307_v18 = vadd.f32 %v1306_v42, %v1304_v56  ;;  %1527 = vmatpush.bf16.msrb.mxu3 %v1759_v0  ;;  %v1874_v56 = vmov 0  }
 0xa4e   :  { %v1300_v26 = vrot.slane %v1299_v16, 2  ;;  %v1313_v21 = vadd.f32 %v1312_v51, %v1305_v57  ;;  %1773 = vset.pattern.permute.xlu1 %v1874_v56  ;;  %1774 = vset.pattern.permute.xlu2 %v1874_v56 }
 0xa4f   :  { %v1295_v22 = vadd.f32 %v1294_v17, %v1293_v15  ;;  %v1308_v23 = vrot.slane %v1307_v18, 2  ;;  %1775 = vset.pattern.permute.xlu0 %v1874_v56 }
 0xa50   :  { %v1301_v25 = vadd.f32 %v1300_v26, %v1299_v16  ;;  %v1314_v27 = vrot.slane %v1313_v21, 2 }
 0xa51   :  { %v1296_v28 = vrot.slane %v1295_v22, 1  ;;  %v1309_v29 = vadd.f32 %v1308_v23, %v1307_v18  ;;  %1528 = vmatpush.bf16.msrb.mxu3 %v1758_v45  ;;  %v1672_v18 = vld [vmem:[%s2529_s12 + $0x1] ss:$2 sm:$0x3] }
 0xa52   :  { %v1302_v30 = vrot.slane %v1301_v25, 1  ;;  %v1315_v31 = vadd.f32 %v1314_v27, %v1313_v21  ;;  %v1673_v21 = vld [vmem:[%s2530_s13 + $0x1] ss:$2 sm:$0x3]  ;;  %v1361_v23 = vperm.slane %v1672_v18, 0 }
 0xa53   :  { %v1310_v7 = vrot.slane %v1309_v29, 1  ;;  %v1297_v19 = vadd.f32 %v1296_v28, %v1295_v22 }
 0xa54   :  { %v1316_v20 = vrot.slane %v1315_v31, 1  ;;  %v1303_v33 = vadd.f32 %v1302_v30, %v1301_v25 }
 0xa55   :  { %v1311_v32 = vadd.f32 %v1310_v7, %v1309_v29  ;;  %v1362_v29 = vperm.slane %v1672_v18, 1 }
 0xa56   :  { %v1317_v54 = vadd.f32 %v1316_v20, %v1315_v31  ;;  %v1368_v31 = vperm.slane %v1673_v21, 0  ;;  %v1369_v20 = vperm.slane %v1673_v21, 1 }
 0xa57   :  { %v1318_v55 = vsel %vm327_vm8, %v1297_v19, %v1311_v32 }
 0xa58   :  { %1320 = vrot.lane.b32.xlu0 %v1318_v55, %s1871_s5  ;;  %v1319_v34 = vsel %vm327_vm8, %v1303_v33, %v1317_v54 }
 0xa59   :  { %1322 = vrot.lane.b32.xlu1 %v1319_v34, %s1871_s5 }
 0xa61   :  { %1537 = vperm.xlu1 %1773, %v1534_v5  }
 0xaca   :  { %v1321_v35 = vpop.permute.xlu0 %1320 }
 0xacb   :  { %v1323_v37 = vpop.permute.xlu1 %1322 }
 0xacc   :  { %v1324_v38 = vsel %vm220_vm7, %v1321_v35, %v1323_v37  ;;  %v1325_v24 = vsel %vm220_vm7, %v1323_v37, %v1321_v35 }
 0xacd   :  { %v1326_v40 = vadd.f32 %v1325_v24, %v1318_v55  ;;  %v1327_v41 = vadd.f32 %v1324_v38, %v1319_v34 }
 0xacf   :  { %1328 = vrot.lane.b32.xlu2 %v1326_v40, %s1872_s22  ;;  %1330 = vrot.lane.b32.xlu0 %v1327_v41, %s1872_s22 }
 0xad3   :  { %v1538_v38 = vpop.permute.xlu1 %1537 }
 0xad7   :  { %1544 = vperm.xlu2 %1774, %v1541_v36  }
 0xb29   :  { %v1329_v10 = vpop.permute.xlu2 %1328 }
 0xb41   :  { %v1331_v60 = vpop.permute.xlu0 %1330 }
 0xb42   :  { %v1332_v61 = vsel %vm202_vm6, %v1329_v10, %v1331_v60  ;;  %v1333_v62 = vsel %vm202_vm6, %v1331_v60, %v1329_v10 }
 0xb43   :  { %v1334_v63 = vadd.f32 %v1333_v62, %v1326_v40  ;;  %v1335_v13 = vadd.f32 %v1332_v61, %v1327_v41  ;;  %v1545_v41 = vpop.permute.xlu2 %1544 }
 0xb45   :  { %v1336_v2 = vadd.f32 %v1335_v13, %v1334_v63 }
 0xb47   :  { %v1337_v3 = vmul.f32 0.015625, %v1336_v2 }
 0xb49   :  { %v1338_v8 = vmul.f32 %v1337_v3, %v1337_v3  ;;  %v1343_v17 = vperm.slane %v1337_v3, 0 }
 0xb4b   :  { %v1340_v9 = vrot.slane %v1338_v8, 7  ;;  %v1344_v25 = vsub.f32 %v2422_v12, %v1343_v17  ;;  %v1345_v28 = vsub.f32 %v2425_v6, %v1343_v17  ;;  %v1781_v12 = vld [vmem:[%s2532_s15] ss:$0 sm:$0xff] }
 0xb4d   :  { %v1342_v11 = vsub.f32 %v1337_v3, %v1340_v9 }
 0xb4f   :  { %v1346_v14 = vadd.f32 1e-05, %v1342_v11 }
 0xb51   :  { %1828 = vrsqrt.f32 %v1346_v14  ;;  %vm1353_vm3 = vweird.f32 %v1346_v14 }
 0xb57   :  { %v1829_v57 = vpop.eup %1828 }
 0xb58   :  { %v1348_v15 = vmul.f32 %v1829_v57, %v1346_v14  ;;  %vm1354_vm2 = vweird.f32 %v1829_v57 }
 0xb59   :  { %vm1355_vm4 = vmor %vm1353_vm3, %vm1354_vm2 }
 0xb5a   :  { %v1349_v42 = vmul.f32 %v1829_v57, %v1348_v15 }
 0xb5c   :  { %v1350_v16 = vmul.f32 0.5, %v1349_v42 }
 0xb5e   :  { %v1351_v51 = vsub.f32 1.5, %v1350_v16 }
 0xb60   :  { %v1352_v26 = vmul.f32 %v1829_v57, %v1351_v51 }
 0xb62   :  { %v1356_v22 = vsel %vm1355_vm4, %v1829_v57, %v1352_v26 }
 0xb63   :  { %v1357_v27 = vperm.slane %v1356_v22, 1 }
 0xb65   :  { %v1358_v30 = vmul.f32 %v1357_v27, %v1344_v25  ;;  %v1359_v7 = vmul.f32 %v1357_v27, %v1345_v28 }
 0xb67   :  { %v1365_v19 = vmul.f32 %v1361_v23, %v1358_v30  ;;  %v1366_v32 = vmul.f32 %v1362_v29, %v1359_v7 }
 0xb69   :  { %v1372_v33 = vadd.f32 %v1368_v31, %v1365_v19  ;;  %v1373_v54 = vadd.f32 %v1369_v20, %v1366_v32 }
 0xb6b   :  { %v1374_v55 = vpack.c.bf16 %v1372_v33, %v1372_v33  ;;  %v1375_v34 = vpack.c.bf16 %v1373_v54, %v1373_v54 }
 0xb6d   :  { %1516 = vmatmul.bf16.vlgmr.msrb.gmra.mxu1 %v1374_v55  ;;  %1529 = vmatmul.bf16.vlgmr.msrb.gmra.mxu3 %v1375_v34 }
 0xbea   :  { %v1517_v35 = vpop.f32.mrf.mxu1 }
 0xbeb   :  { %v1518_v37 = vadd.f32 %v1781_v12, %v1517_v35 }
 0xbf0   :  { %v1530_v6 = vpop.f32.mrf.mxu3 }
 0xbf1   :  { %v1531_v24 = vadd.f32 %v1530_v6, %v1518_v37 }
 0xbf2   :  { %v1519_v40 = vpop.f32.mrf.mxu1 }
 0xbf3   :  { %v1540_v43 = vmul.f32 %v1538_v38, %v1531_v24 }
 0xbf5   :  { %v1547_v44 = vadd.f32 %v1545_v41, %v1540_v43 }
 0xbf7   :  { %1549 = vst.msk [vmem:[#allocation5] sm:$0xff] %vm1548_vm5, %v1547_v44 }
 0xbf8   :  { %v1532_v48 = vpop.f32.mrf.mxu3  ;;  %1560 = dma.vmem_to_hbm [thread:$0]  %s1556_s23, 128, %s1558_s27, [#allocation3]  }
 0xbf9   :  { %1868 = dma.done.wait [#allocation3], 128  }
 0xbfa   :  { %1869 = vsyncadd [#allocation3], 4294967168 }
 0xbfb   :  { %1565 = vsyncpa [#allocation3], 1 }
 0xbfc   :  { %1566 = vsyncpa [#allocation4], 1 }

</bundles_post_ra>
